<compile_context>
chip_gen: v7x
topology: tpu7x:2x2x1
jax: 0.10.0
libtpu: 0.0.40
codegen_flags: <defaults>
</compile_context>

<pallas_src>
import functools

import jax
import jax.numpy as jnp
from jax.experimental import pallas as pl
from jax.experimental.pallas import tpu as pltpu


def _round_up(x, m):
    return ((x + m - 1) // m) * m


def _vmem_capacity_bytes():
    """Physical VMEM per TensorCore (v5e/v6e: 128 MiB, v7x: 64 MiB)."""
    try:
        cap = int(pltpu.get_tpu_info().vmem_capacity_bytes)
        if cap > 0:
            return cap
    except Exception:
        pass
    return 64 * 1024 * 1024  # conservative fallback (v7x size) -- safe on every generation


def _derive_block_h(h, wp, cin, cout_pad, in_bytes, out_bytes, vmem_budget_bytes):
    """Largest multiple-of-8 row-tile height whose working set fits the VMEM budget."""
    # Per output row (of padded width wp):
    #   input window (double-buffered) + one live tap temporary : ~3 * wp*cin*in_bytes
    #   f32 accumulator + epilogue temporary                    : ~2 * wp*cout_pad*4
    #   output block (double-buffered)                          :  2 * wp*cout_pad*out_bytes
    per_row = (3 * wp * cin * in_bytes
               + 2 * wp * cout_pad * 4
               + 2 * wp * cout_pad * out_bytes)
    # Grid-invariant blocks (weights, scale, shift; double-buffered) + halo rows.
    fixed = (2 * 9 * cin * cout_pad * in_bytes
             + 2 * 2 * cout_pad * 4
             + 3 * 3 * wp * cin * in_bytes)
    avail = int(vmem_budget_bytes * 0.85) - fixed
    if avail <= 0:
        return 8
    bh = (avail // per_row) // 8 * 8
    return int(max(8, bh))


# ----------------------- fused 3x3 conv + BN + ReLU kernel -----------------------

def _conv3x3_bn_relu_kernel(x_ref, w_ref, scale_ref, shift_ref, o_ref, *, wp):
    # x_ref     : ((BH+3)*Wp, Cin)   one padded row tile, incl. 2 halo rows (+1 slack row)
    # w_ref     : (9, Cin, Cout_pad) conv weights, tap-major [kh*3 + kw]
    # scale_ref : (1, Cout_pad) f32  folded BN scale (eval mode)
    # shift_ref : (1, Cout_pad) f32  folded BN shift
    # o_ref     : (BH*Wp, Cout_pad)  fused conv + BN + ReLU output tile (rows flattened)
    rows_out = o_ref.shape[0]

    # 9 accumulating per-tap matmuls (K = Cin) -- no materialized im2col / concat.
    acc = None
    for kh in range(3):
        for kw in range(3):
            # Output pixel (y, x) reads input pixel (y + kh, x + kw): flat offset kh*Wp + kw.
            tap = x_ref[pl.ds(kh * wp + kw, rows_out), :]
            part = jnp.dot(tap, w_ref[kh * 3 + kw], preferred_element_type=jnp.float32)
            acc = part if acc is None else acc + part

    y = acc * scale_ref[...] + shift_ref[...]          # BN affine applied in f32
    o_ref[...] = jnp.maximum(y, 0.0).astype(o_ref.dtype)


def conv3x3_bn_relu_nhwc(x_nhwc, w_torch, scale, shift, *, block_h=None,
                         compute_dtype=jnp.float32):
    """Conv2d(3x3, stride=1, pad=1, bias=False) + BatchNorm(eval) + ReLU. NHWC in/out."""
    n, h, w, cin = x_nhwc.shape
    cout = w_torch.shape[0]
    assert w_torch.shape == (cout, cin, 3, 3), w_torch.shape

    compute_dtype = jnp.dtype(compute_dtype)
    out_dtype = (jnp.dtype(jnp.bfloat16) if compute_dtype == jnp.dtype(jnp.bfloat16)
                 else jnp.dtype(jnp.float32))
    in_bytes = compute_dtype.itemsize
    out_bytes = out_dtype.itemsize

    wp = _round_up(w + 2, 8)            # padded width: halo + sublane alignment
    cout_pad = _round_up(cout, 128)     # lane-dense output / full MXU N dimension

    vmem_cap = _vmem_capacity_bytes()
    vmem_limit = min((vmem_cap * 3) // 4, 100 * 1024 * 1024)   # 48 MiB on v7x, 96 MiB on v5e/v6e

    if block_h is None:
        block_h = _derive_block_h(h, wp, cin, cout_pad, in_bytes, out_bytes, vmem_limit)
    block_h = max(8, (int(block_h) // 8) * 8)
    block_h = min(block_h, _round_up(h, 8))
    if n == 1 and h > 8:   # keep >= 2 grid steps so both v7x TensorCores get work
        block_h = min(block_h, max(8, _round_up((h + 1) // 2, 8)))

    h_pad = _round_up(h, block_h)
    num_tiles = h_pad // block_h
    tile_rows = block_h + 3             # +2 halo rows, +1 slack row so every tap slice is in-bounds
    rows_in = tile_rows * wp
    rows_out = block_h * wp

    # Single zero-padded copy + gather of OVERLAPPING row tiles: the halo is baked into the
    # HBM layout, so each grid step needs exactly one contiguous DMA and no in-kernel concat.
    xp = jnp.pad(x_nhwc.astype(compute_dtype),
                 ((0, 0), (1, h_pad - h + 2), (1, wp - w - 1), (0, 0)))
    row_idx = (jnp.arange(num_tiles)[:, None] * block_h
               + jnp.arange(tile_rows)[None, :])               # (T, BH+3)
    x_tiles = xp[:, row_idx, :, :]                              # (N, T, BH+3, Wp, Cin)
    x_tiles = x_tiles.reshape(n * num_tiles, rows_in, cin)

    # Weights tap-major with Cout zero-padded to a lane multiple. BN scale/shift stay f32 and
    # are applied in the f32 epilogue (more accurate than folding the scale into bf16 weights).
    w_hwio = jnp.transpose(w_torch, (2, 3, 1, 0))               # (3, 3, Cin, Cout)
    w_eff = jnp.pad(w_hwio, ((0, 0), (0, 0), (0, 0), (0, cout_pad - cout)))
    w_eff = w_eff.reshape(9, cin, cout_pad).astype(compute_dtype)
    scale_p = jnp.pad(scale.astype(jnp.float32), (0, cout_pad - cout)).reshape(1, cout_pad)
    shift_p = jnp.pad(shift.astype(jnp.float32), (0, cout_pad - cout)).reshape(1, cout_pad)

    kernel = functools.partial(_conv3x3_bn_relu_kernel, wp=wp)

    out2d = pl.pallas_call(
        kernel,
        out_shape=jax.ShapeDtypeStruct((n * h_pad * wp, cout_pad), out_dtype),
        grid_spec=pltpu.PrefetchScalarGridSpec(
            num_scalar_prefetch=0,
            grid=(n, num_tiles),
            in_specs=[
                # one overlapping row tile per grid step (leading dim squeezed away)
                pl.BlockSpec((None, rows_in, cin),
                             lambda b, r: (b * num_tiles + r, 0, 0)),
                pl.BlockSpec((9, cin, cout_pad), lambda b, r: (0, 0, 0)),
                pl.BlockSpec((1, cout_pad), lambda b, r: (0, 0)),
                pl.BlockSpec((1, cout_pad), lambda b, r: (0, 0)),
            ],
            out_specs=pl.BlockSpec((rows_out, cout_pad),
                                   lambda b, r: (b * num_tiles + r, 0)),
        ),
        compiler_params=pltpu.CompilerParams(
            dimension_semantics=("parallel", "parallel"),
            vmem_limit_bytes=vmem_limit,
        ),
    )(x_tiles, w_eff, scale_p, shift_p)

    # Rows >= h, widths >= w and channels >= cout are zero-padding artefacts -> slice off.
    out = out2d.reshape(n, h_pad, wp, cout_pad)[:, :h, :w, :cout]
    return out


def conv_block_forward(x_nchw, w_torch, scale, shift, *, block_h=None,
                       compute_dtype=jnp.float32):
    """ConvBlock.forward (NCHW in / NCHW out)."""
    x = jnp.transpose(x_nchw, (0, 2, 3, 1))          # NCHW -> NHWC (channels on lanes)
    y = conv3x3_bn_relu_nhwc(x, w_torch, scale, shift, block_h=block_h,
                             compute_dtype=compute_dtype)
    return jnp.transpose(y, (0, 3, 1, 2))            # NHWC -> NCHW


# ------------------------------- pure-JAX reference -------------------------------

def ref_forward(x_nchw, w_torch, scale, shift):
    x = jnp.transpose(x_nchw, (0, 2, 3, 1)).astype(jnp.float32)
    w_hwio = jnp.transpose(w_torch, (2, 3, 1, 0)).astype(jnp.float32)
    y = jax.lax.conv_general_dilated(
        x, w_hwio, window_strides=(1, 1), padding=((1, 1), (1, 1)),
        dimension_numbers=("NHWC", "HWIO", "NHWC"),
        precision=jax.lax.Precision.HIGHEST)
    y = jnp.maximum(y * scale + shift, 0.0)
    return jnp.transpose(y, (0, 3, 1, 2))


# -------------------------------------- main --------------------------------------

if __name__ == "__main__":
    N, Cin, Cout, H, W = 2, 16, 32, 16, 16

    key = jax.random.PRNGKey(0)
    k0, k1, k2, k3, k4, k5 = jax.random.split(key, 6)
    x_nchw = jax.random.normal(k0, (N, Cin, H, W), jnp.float32)
    w_torch = 0.2 * jax.random.normal(k1, (Cout, Cin, 3, 3), jnp.float32)

    eps = 1e-5
    gamma = 1.0 + 0.1 * jax.random.normal(k2, (Cout,), jnp.float32)
    beta = 0.1 * jax.random.normal(k3, (Cout,), jnp.float32)
    mean = 0.1 * jax.random.normal(k4, (Cout,), jnp.float32)
    var = jax.random.uniform(k5, (Cout,), jnp.float32, minval=0.5, maxval=1.5)
    scale = gamma / jnp.sqrt(var + eps)       # folded BN (eval mode)
    shift = beta - mean * scale

    fwd = jax.jit(conv_block_forward, static_argnames=("block_h", "compute_dtype"))

    # f32 path (block_h / vmem limit auto-derived from the VMEM budget)
    out = jax.block_until_ready(fwd(x_nchw, w_torch, scale, shift))
    ref = jax.block_until_ready(ref_forward(x_nchw, w_torch, scale, shift))
    assert out.shape == (N, Cout, H, W), out.shape
    if not jnp.allclose(out, ref, atol=2e-2, rtol=2e-2):
        raise AssertionError(
            f"f32 mismatch vs reference, max abs diff = {float(jnp.max(jnp.abs(out - ref)))}")

    # bf16 activations/weights with f32 MXU accumulation + f32 BN/ReLU epilogue; bf16 output
    # halves HBM traffic on memory-bound generations (esp. v5e).
    out_bf16 = jax.block_until_ready(
        fwd(x_nchw, w_torch, scale, shift, compute_dtype=jnp.bfloat16))
    out_bf16_f32 = out_bf16.astype(jnp.float32)
    if not jnp.allclose(out_bf16_f32, ref, atol=2e-1, rtol=5e-2):
        raise AssertionError(
            f"bf16 mismatch vs reference, max abs diff = "
            f"{float(jnp.max(jnp.abs(out_bf16_f32 - ref)))}")

    print("KERNEL_OK")
</pallas_src>

<mosaic_0001>
module attributes {stable_mosaic.version = 11 : i64} {
  func.func @_conv3x3_bn_relu_kernel(%arg0: i32, %arg1: i32, %arg2: memref<1x456x16xf32, #tpu.memory_space<vmem>>, %arg3: memref<9x16x128xf32, #tpu.memory_space<vmem>>, %arg4: memref<1x128xf32, #tpu.memory_space<vmem>>, %arg5: memref<1x128xf32, #tpu.memory_space<vmem>>, %arg6: memref<384x128xf32, #tpu.memory_space<vmem>>) attributes {dimension_semantics = [#tpu.dimension_semantics<parallel>, #tpu.dimension_semantics<parallel>], iteration_bounds = array<i64: 2, 1>, scalar_prefetch = 0 : i64, scratch_operands = 0 : i64, tpu.core_type = #tpu.core_type<tc>, window_params = [{transform_indices = @transform_0, window_bounds = array<i64: 1, 456, 16>}, {pipeline_mode = #tpu.pipeline_mode<synchronous>, transform_indices = @transform_1, window_bounds = array<i64: 9, 16, 128>}, {pipeline_mode = #tpu.pipeline_mode<synchronous>, transform_indices = @transform_2, window_bounds = array<i64: 1, 128>}, {pipeline_mode = #tpu.pipeline_mode<synchronous>, transform_indices = @transform_3, window_bounds = array<i64: 1, 128>}, {transform_indices = @transform_4, window_bounds = array<i64: 384, 128>}]} {
    %c0 = arith.constant 0 : index
    %c0_0 = arith.constant 0 : index
    %c0_1 = arith.constant 0 : index
    %0 = vector.load %arg2[%c0, %c0_0, %c0_1] : memref<1x456x16xf32, #tpu.memory_space<vmem>>, vector<1x384x16xf32>
    %1 = vector.shape_cast %0 : vector<1x384x16xf32> to vector<384x16xf32>
    %c0_2 = arith.constant 0 : index
    %c0_3 = arith.constant 0 : index
    %c0_4 = arith.constant 0 : index
    %2 = vector.load %arg3[%c0_2, %c0_3, %c0_4] : memref<9x16x128xf32, #tpu.memory_space<vmem>>, vector<1x16x128xf32>
    %3 = vector.shape_cast %2 : vector<1x16x128xf32> to vector<16x128xf32>
    %cst = arith.constant dense<0.000000e+00> : vector<384x128xf32>
    %4 = tpu.matmul %1, %3, %cst {dimension_numbers = #tpu.dot_dimension_numbers<[1], [0], [0], [1], [0, 0, 1, 1], [], []>} : vector<384x16xf32>, vector<16x128xf32>, vector<384x128xf32> -> vector<384x128xf32>
    %c0_5 = arith.constant 0 : index
    %c1 = arith.constant 1 : index
    %c0_6 = arith.constant 0 : index
    %5 = vector.load %arg2[%c0_5, %c1, %c0_6] : memref<1x456x16xf32, #tpu.memory_space<vmem>>, vector<1x384x16xf32>
    %6 = vector.shape_cast %5 : vector<1x384x16xf32> to vector<384x16xf32>
    %c1_7 = arith.constant 1 : index
    %c0_8 = arith.constant 0 : index
    %c0_9 = arith.constant 0 : index
    %7 = vector.load %arg3[%c1_7, %c0_8, %c0_9] : memref<9x16x128xf32, #tpu.memory_space<vmem>>, vector<1x16x128xf32>
    %8 = vector.shape_cast %7 : vector<1x16x128xf32> to vector<16x128xf32>
    %cst_10 = arith.constant dense<0.000000e+00> : vector<384x128xf32>
    %9 = tpu.matmul %6, %8, %cst_10 {dimension_numbers = #tpu.dot_dimension_numbers<[1], [0], [0], [1], [0, 0, 1, 1], [], []>} : vector<384x16xf32>, vector<16x128xf32>, vector<384x128xf32> -> vector<384x128xf32>
    %10 = arith.addf %4, %9 : vector<384x128xf32>
    %c0_11 = arith.constant 0 : index
    %c2 = arith.constant 2 : index
    %c0_12 = arith.constant 0 : index
    %11 = vector.load %arg2[%c0_11, %c2, %c0_12] : memref<1x456x16xf32, #tpu.memory_space<vmem>>, vector<1x384x16xf32>
    %12 = vector.shape_cast %11 : vector<1x384x16xf32> to vector<384x16xf32>
    %c2_13 = arith.constant 2 : index
    %c0_14 = arith.constant 0 : index
    %c0_15 = arith.constant 0 : index
    %13 = vector.load %arg3[%c2_13, %c0_14, %c0_15] : memref<9x16x128xf32, #tpu.memory_space<vmem>>, vector<1x16x128xf32>
    %14 = vector.shape_cast %13 : vector<1x16x128xf32> to vector<16x128xf32>
    %cst_16 = arith.constant dense<0.000000e+00> : vector<384x128xf32>
    %15 = tpu.matmul %12, %14, %cst_16 {dimension_numbers = #tpu.dot_dimension_numbers<[1], [0], [0], [1], [0, 0, 1, 1], [], []>} : vector<384x16xf32>, vector<16x128xf32>, vector<384x128xf32> -> vector<384x128xf32>
    %16 = arith.addf %10, %15 : vector<384x128xf32>
    %c0_17 = arith.constant 0 : index
    %c24 = arith.constant 24 : index
    %c0_18 = arith.constant 0 : index
    %17 = vector.load %arg2[%c0_17, %c24, %c0_18] : memref<1x456x16xf32, #tpu.memory_space<vmem>>, vector<1x384x16xf32>
    %18 = vector.shape_cast %17 : vector<1x384x16xf32> to vector<384x16xf32>
    %c3 = arith.constant 3 : index
    %c0_19 = arith.constant 0 : index
    %c0_20 = arith.constant 0 : index
    %19 = vector.load %arg3[%c3, %c0_19, %c0_20] : memref<9x16x128xf32, #tpu.memory_space<vmem>>, vector<1x16x128xf32>
    %20 = vector.shape_cast %19 : vector<1x16x128xf32> to vector<16x128xf32>
    %cst_21 = arith.constant dense<0.000000e+00> : vector<384x128xf32>
    %21 = tpu.matmul %18, %20, %cst_21 {dimension_numbers = #tpu.dot_dimension_numbers<[1], [0], [0], [1], [0, 0, 1, 1], [], []>} : vector<384x16xf32>, vector<16x128xf32>, vector<384x128xf32> -> vector<384x128xf32>
    %22 = arith.addf %16, %21 : vector<384x128xf32>
    %c0_22 = arith.constant 0 : index
    %c25 = arith.constant 25 : index
    %c0_23 = arith.constant 0 : index
    %23 = vector.load %arg2[%c0_22, %c25, %c0_23] : memref<1x456x16xf32, #tpu.memory_space<vmem>>, vector<1x384x16xf32>
    %24 = vector.shape_cast %23 : vector<1x384x16xf32> to vector<384x16xf32>
    %c4 = arith.constant 4 : index
    %c0_24 = arith.constant 0 : index
    %c0_25 = arith.constant 0 : index
    %25 = vector.load %arg3[%c4, %c0_24, %c0_25] : memref<9x16x128xf32, #tpu.memory_space<vmem>>, vector<1x16x128xf32>
    %26 = vector.shape_cast %25 : vector<1x16x128xf32> to vector<16x128xf32>
    %cst_26 = arith.constant dense<0.000000e+00> : vector<384x128xf32>
    %27 = tpu.matmul %24, %26, %cst_26 {dimension_numbers = #tpu.dot_dimension_numbers<[1], [0], [0], [1], [0, 0, 1, 1], [], []>} : vector<384x16xf32>, vector<16x128xf32>, vector<384x128xf32> -> vector<384x128xf32>
    %28 = arith.addf %22, %27 : vector<384x128xf32>
    %c0_27 = arith.constant 0 : index
    %c26 = arith.constant 26 : index
    %c0_28 = arith.constant 0 : index
    %29 = vector.load %arg2[%c0_27, %c26, %c0_28] : memref<1x456x16xf32, #tpu.memory_space<vmem>>, vector<1x384x16xf32>
    %30 = vector.shape_cast %29 : vector<1x384x16xf32> to vector<384x16xf32>
    %c5 = arith.constant 5 : index
    %c0_29 = arith.constant 0 : index
    %c0_30 = arith.constant 0 : index
    %31 = vector.load %arg3[%c5, %c0_29, %c0_30] : memref<9x16x128xf32, #tpu.memory_space<vmem>>, vector<1x16x128xf32>
    %32 = vector.shape_cast %31 : vector<1x16x128xf32> to vector<16x128xf32>
    %cst_31 = arith.constant dense<0.000000e+00> : vector<384x128xf32>
    %33 = tpu.matmul %30, %32, %cst_31 {dimension_numbers = #tpu.dot_dimension_numbers<[1], [0], [0], [1], [0, 0, 1, 1], [], []>} : vector<384x16xf32>, vector<16x128xf32>, vector<384x128xf32> -> vector<384x128xf32>
    %34 = arith.addf %28, %33 : vector<384x128xf32>
    %c0_32 = arith.constant 0 : index
    %c48 = arith.constant 48 : index
    %c0_33 = arith.constant 0 : index
    %35 = vector.load %arg2[%c0_32, %c48, %c0_33] : memref<1x456x16xf32, #tpu.memory_space<vmem>>, vector<1x384x16xf32>
    %36 = vector.shape_cast %35 : vector<1x384x16xf32> to vector<384x16xf32>
    %c6 = arith.constant 6 : index
    %c0_34 = arith.constant 0 : index
    %c0_35 = arith.constant 0 : index
    %37 = vector.load %arg3[%c6, %c0_34, %c0_35] : memref<9x16x128xf32, #tpu.memory_space<vmem>>, vector<1x16x128xf32>
    %38 = vector.shape_cast %37 : vector<1x16x128xf32> to vector<16x128xf32>
    %cst_36 = arith.constant dense<0.000000e+00> : vector<384x128xf32>
    %39 = tpu.matmul %36, %38, %cst_36 {dimension_numbers = #tpu.dot_dimension_numbers<[1], [0], [0], [1], [0, 0, 1, 1], [], []>} : vector<384x16xf32>, vector<16x128xf32>, vector<384x128xf32> -> vector<384x128xf32>
    %40 = arith.addf %34, %39 : vector<384x128xf32>
    %c0_37 = arith.constant 0 : index
    %c49 = arith.constant 49 : index
    %c0_38 = arith.constant 0 : index
    %41 = vector.load %arg2[%c0_37, %c49, %c0_38] : memref<1x456x16xf32, #tpu.memory_space<vmem>>, vector<1x384x16xf32>
    %42 = vector.shape_cast %41 : vector<1x384x16xf32> to vector<384x16xf32>
    %c7 = arith.constant 7 : index
    %c0_39 = arith.constant 0 : index
    %c0_40 = arith.constant 0 : index
    %43 = vector.load %arg3[%c7, %c0_39, %c0_40] : memref<9x16x128xf32, #tpu.memory_space<vmem>>, vector<1x16x128xf32>
    %44 = vector.shape_cast %43 : vector<1x16x128xf32> to vector<16x128xf32>
    %cst_41 = arith.constant dense<0.000000e+00> : vector<384x128xf32>
    %45 = tpu.matmul %42, %44, %cst_41 {dimension_numbers = #tpu.dot_dimension_numbers<[1], [0], [0], [1], [0, 0, 1, 1], [], []>} : vector<384x16xf32>, vector<16x128xf32>, vector<384x128xf32> -> vector<384x128xf32>
    %46 = arith.addf %40, %45 : vector<384x128xf32>
    %c0_42 = arith.constant 0 : index
    %c50 = arith.constant 50 : index
    %c0_43 = arith.constant 0 : index
    %47 = vector.load %arg2[%c0_42, %c50, %c0_43] : memref<1x456x16xf32, #tpu.memory_space<vmem>>, vector<1x384x16xf32>
    %48 = vector.shape_cast %47 : vector<1x384x16xf32> to vector<384x16xf32>
    %c8 = arith.constant 8 : index
    %c0_44 = arith.constant 0 : index
    %c0_45 = arith.constant 0 : index
    %49 = vector.load %arg3[%c8, %c0_44, %c0_45] : memref<9x16x128xf32, #tpu.memory_space<vmem>>, vector<1x16x128xf32>
    %50 = vector.shape_cast %49 : vector<1x16x128xf32> to vector<16x128xf32>
    %cst_46 = arith.constant dense<0.000000e+00> : vector<384x128xf32>
    %51 = tpu.matmul %48, %50, %cst_46 {dimension_numbers = #tpu.dot_dimension_numbers<[1], [0], [0], [1], [0, 0, 1, 1], [], []>} : vector<384x16xf32>, vector<16x128xf32>, vector<384x128xf32> -> vector<384x128xf32>
    %52 = arith.addf %46, %51 : vector<384x128xf32>
    %c0_47 = arith.constant 0 : index
    %c0_48 = arith.constant 0 : index
    %53 = vector.load %arg4[%c0_47, %c0_48] : memref<1x128xf32, #tpu.memory_space<vmem>>, vector<1x128xf32>
    %54 = vector.broadcast %53 : vector<1x128xf32> to vector<384x128xf32>
    %55 = arith.mulf %52, %54 : vector<384x128xf32>
    %c0_49 = arith.constant 0 : index
    %c0_50 = arith.constant 0 : index
    %56 = vector.load %arg5[%c0_49, %c0_50] : memref<1x128xf32, #tpu.memory_space<vmem>>, vector<1x128xf32>
    %57 = vector.broadcast %56 : vector<1x128xf32> to vector<384x128xf32>
    %58 = arith.addf %55, %57 : vector<384x128xf32>
    %cst_51 = arith.constant 0.000000e+00 : f32
    %59 = vector.broadcast %cst_51 : f32 to vector<384x128xf32>
    %60 = arith.maximumf %58, %59 : vector<384x128xf32>
    %c0_52 = arith.constant 0 : index
    %c0_53 = arith.constant 0 : index
    %61 = vector.load %arg6[%c0_52, %c0_53] : memref<384x128xf32, #tpu.memory_space<vmem>>, vector<384x128xf32>
    tpu.vector_store %arg6[%c0_52, %c0_53], %60 {strides = array<i32>} : memref<384x128xf32, #tpu.memory_space<vmem>>, vector<384x128xf32>,
    return
  }
  func.func @transform_0(%arg0: i32, %arg1: i32) -> (i32, i32, i32) {
    %c1_i32 = arith.constant 1 : i32
    %0 = arith.muli %arg0, %c1_i32 : i32
    %1 = arith.addi %0, %arg1 : i32
    %c0_i32 = arith.constant 0 : i32
    %c0_i32_0 = arith.constant 0 : i32
    %c0_i32_1 = arith.constant 0 : i32
    return %1, %c0_i32, %c0_i32_0 : i32, i32, i32
  }
  func.func @transform_1(%arg0: i32, %arg1: i32) -> (i32, i32, i32) {
    %c0_i32 = arith.constant 0 : i32
    %c0_i32_0 = arith.constant 0 : i32
    %c0_i32_1 = arith.constant 0 : i32
    %c0_i32_2 = arith.constant 0 : i32
    return %c0_i32, %c0_i32_0, %c0_i32_1 : i32, i32, i32
  }
  func.func @transform_2(%arg0: i32, %arg1: i32) -> (i32, i32) {
    %c0_i32 = arith.constant 0 : i32
    %c0_i32_0 = arith.constant 0 : i32
    %c0_i32_1 = arith.constant 0 : i32
    return %c0_i32, %c0_i32_0 : i32, i32
  }
  func.func @transform_3(%arg0: i32, %arg1: i32) -> (i32, i32) {
    %c0_i32 = arith.constant 0 : i32
    %c0_i32_0 = arith.constant 0 : i32
    %c0_i32_1 = arith.constant 0 : i32
    return %c0_i32, %c0_i32_0 : i32, i32
  }
  func.func @transform_4(%arg0: i32, %arg1: i32) -> (i32, i32) {
    %c1_i32 = arith.constant 1 : i32
    %0 = arith.muli %arg0, %c1_i32 : i32
    %1 = arith.addi %0, %arg1 : i32
    %c0_i32 = arith.constant 0 : i32
    %c0_i32_0 = arith.constant 0 : i32
    return %1, %c0_i32 : i32, i32
  }
}

</mosaic_0001>

<bundles_post_ra>
// kernel: conv_block_forward.1
= control target key start
LH: loop header
LB: loop body
LE: loop exit
PB: predicated region body
PF: predicated region fallthrough
CT: control target
= control target key end

     0   :  { %s7422_s15 = smov 0   ;;  %s7424_s16 = smov 0   ;;  %s9021_s0 = inlined_call_operand.vmem [shape: f32[2,456,16], index: 0, kind: input, shape index: {}]   ;;  %s9022_s1 = inlined_call_operand.vmem [shape: f32[9,16,128], index: 1, kind: input, shape index: {}]   ;;  %s9023_s2 = inlined_call_operand.vmem [shape: f32[1,128], index: 2, kind: input, shape index: {}]   ;;  %s9024_s3 = inlined_call_operand.vmem [shape: f32[1,128], index: 3, kind: input, shape index: {}]   ;;  %s9025_s4 = inlined_call_operand.vmem [shape: f32[768,128], index: 4, kind: output, shape index: {}]  }
   0x1   :  { %s7426_s17 = smov 0  }
   0x2 LB: > { %s26_s18 = sadd.s32 1, %s7391_s16  ;;  %p5337_p0 = scmp.ge.s32.totalorder %s7395_s17, 1  ;;  %s7395_s17 = sphi %s7426_s17, %s14_s17   ;;  %s7391_s16 = sphi %s7424_s16, %s9249_s16   ;;  %s7387_s15 = sphi %s7422_s15, %s9248_s15  }
   0x3   : > { %p28_p1 = scmp.ge.s32.totalorder %s26_s18, 2  ;;  %p180_p2 = scmp.lt.s32.totalorder %s7395_s17, 3 }
   0x5   : > { %s9251_s18 = smov (%p28_p1, %s26_s18), 0  ;;  %p181_p3 = pnand %p5337_p0, %p180_p2 }
   0x7   : > { %184 = sbr.rel (%p181_p3) target bundleno = 673 (0x2a1), region = 36 }
   0xe   : > { %v5340_v0 = vld [vmem:[%s9022_s1 + $0x10] sm:$0xff]  ;;  %v5341_v1 = vld [vmem:[%s9022_s1 + $0x18] sm:$0xff]  ;;  %v5538_v2 = vld [vmem:[%s9022_s1 + $0x40] sm:$0xff]  ;;  %p209_p4 = scmp.lt.s32.totalorder %s7387_s15, 1  ;;  %vm324_vm0 = vcmask 130048   ;;  %s216_s12 = smul.u32 48, %s7387_s15 }
   0xf   : > { %v6926_v3 = vpack.c.bf16 %v5341_v1, %v5340_v0  ;;  %v5539_v4 = vld [vmem:[%s9022_s1 + $0x48] sm:$0xff]  ;;  %v271_v5 = vld [vmem:[%s9022_s1] sm:$0xff]  ;;  %v5588_v9 = vld [vmem:[%s9022_s1 + $0x50] sm:$0xff] }
  0x10   : > { %v272_v6 = vld [vmem:[%s9022_s1 + $0x8] sm:$0xff]  ;;  %v7461_v7 = vpack.c.bf16 %v5539_v4, %v5538_v2  ;;  %s210_s5 = scalar_select %p209_p4, %s7387_s15, 1  ;;  %v5589_v10 = vld [vmem:[%s9022_s1 + $0x58] sm:$0xff]  ;;  %v5638_v12 = vld [vmem:[%s9022_s1 + $0x60] sm:$0xff] }
  0x11   : > { %v6930_v8 = vpack.c.bf16 %v272_v6, %v271_v5  ;;  %6927 = vmatprep.subr.bf16.mxu1 %v6926_v3  ;;  %v6946_v11 = vpack.c.bf16 %v5589_v10, %v5588_v9  ;;  %v5639_v13 = vld [vmem:[%s9022_s1 + $0x68] sm:$0xff]  ;;  %v5438_v14 = vld [vmem:[%s9022_s1 + $0x20] sm:$0xff]  ;;  %v5688_v46 = vld [vmem:[%s9022_s1 + $0x70] sm:$0xff]  ;;  %p217_p5 = scmp.lt.s32.totalorder %s216_s12, 95 }
  0x12   : > { %6943 = vmatprep.subr.bf16.mxu0 %v7461_v7  ;;  %6929 = vmatpush3.bf16.msra.mxu1 %v6926_v3  ;;  %s7348_s10 = smul.u32 456, %s210_s5  ;;  %v5439_v15 = vld [vmem:[%s9022_s1 + $0x28] sm:$0xff]  ;;  %v7497_v22 = vpack.c.bf16 %v5639_v13, %v5638_v12  ;;  %v5689_v47 = vld [vmem:[%s9022_s1 + $0x78] sm:$0xff] }
  0x13   : > { %6945 = vmatpush3.bf16.msra.mxu0 %v7461_v7  ;;  %6931 = vmatprep.subr.bf16.mxu1 %v6930_v8  ;;  %v7499_v23 = vpack.c.bf16 %v5439_v15, %v5438_v14  ;;  %v7667_v49 = vpack.c.bf16 %v5689_v47, %v5688_v46  ;;  %s9253_s12 = smov (!%p217_p5, %s216_s12), 95 }
  0x14   : > { %s7487_s25 = scalar_lea.vmem %s9021_s0, %s7348_s10  ;;  %6947 = vmatprep.subr.bf16.mxu0 %v6946_v11  ;;  %s5339_s20 = sshll.u32 %s9253_s12, 3 }
  0x15   : > { %v273_v16 = vld [vmem:[%s7487_s25 + $0x1] sm:$0xff]  ;;  %v2319_v17 = vld [vmem:[%s7487_s25 + $0x19] sm:$0xff]  ;;  %v274_v18 = vld [vmem:[%s7487_s25 + $0x9] sm:$0xff]  ;;  %s8853_s23 = scalar_lea.vmem %s9025_s4, %s5339_s20 }
  0x16   : > { %6246 = vmatprep.mubr.msk.f32.mxu1 %vm324_vm0, %v273_v16  ;;  %6550 = vmatprep.mubr.msk.f32.mxu0 %vm324_vm0, %v2319_v17  ;;  %v2320_v19 = vld [vmem:[%s7487_s25 + $0x21] sm:$0xff]  ;;  %v275_v20 = vld [vmem:[%s7487_s25 + $0x11] sm:$0xff]  ;;  %v2321_v21 = vld [vmem:[%s7487_s25 + $0x29] sm:$0xff] }
  0x17   : > { %6247 = vmatmul.mubr.msk.f32.vlgmr.msra.gmra.mrb[0].mxu1 %vm324_vm0, %v274_v18  ;;  %6551 = vmatmul.mubr.msk.f32.vlgmr.msra.gmra.mrb[0].mxu0 %vm324_vm0, %v2320_v19  ;;  %v7504_v24 = vld [vmem:[%s7487_s25 + $0x31] sm:$0xff]  ;;  %v7509_v25 = vld [vmem:[%s7487_s25 + $0x39] sm:$0xff]  ;;  %v7520_v26 = vld [vmem:[%s7487_s25 + $0x41] sm:$0xff] }
  0x18   : > { %6933 = vmatpush3.bf16.msra.mxu1 %v6930_v8  ;;  %6949 = vmatpush3.bf16.msra.mxu0 %v6946_v11  ;;  %v7523_v27 = vld [vmem:[%s7487_s25 + $0x49] sm:$0xff]  ;;  %v7533_v28 = vld [vmem:[%s7487_s25 + $0x51] sm:$0xff]  ;;  %v7536_v29 = vld [vmem:[%s7487_s25 + $0x59] sm:$0xff] }
  0x19   : > { %6249 = vmatprep.mubr.msk.f32.mxu1 %vm324_vm0, %v275_v20  ;;  %6553 = vmatprep.mubr.msk.f32.mxu0 %vm324_vm0, %v2321_v21  ;;  %v7547_v30 = vld [vmem:[%s7487_s25 + $0x61] sm:$0xff]  ;;  %v7550_v31 = vld [vmem:[%s7487_s25 + $0x69] sm:$0xff]  ;;  %v7561_v32 = vld [vmem:[%s7487_s25 + $0x71] sm:$0xff] }
  0x1a   : > { %6951 = vmatprep.subr.bf16.mxu0 %v7497_v22  ;;  %6935 = vmatprep.subr.bf16.mxu1 %v7499_v23  ;;  %9100 = vst [vmem:[#allocation2_spill] sm:$0xff] %v7550_v31  ;;  %9101 = vst [vmem:[#allocation3_spill] sm:$0xff] %v7561_v32  ;;  %v7564_v33 = vld [vmem:[%s7487_s25 + $0x79] sm:$0xff]  ;;  %v7575_v34 = vld [vmem:[%s7487_s25 + $0x81] sm:$0xff] }
  0x1b   : > { %6250 = vmatmul.mubr.msk.f32.gmra.mrb[2].mxu1 %vm324_vm0, %v2319_v17  ;;  %6554 = vmatmul.mubr.msk.f32.gmra.mrb[2].mxu0 %vm324_vm0, %v7504_v24  ;;  %9102 = vst [vmem:[#allocation4_spill] sm:$0xff] %v7564_v33  ;;  %9103 = vst [vmem:[#allocation5_spill] sm:$0xff] %v7575_v34  ;;  %v7578_v35 = vld [vmem:[%s7487_s25 + $0x89] sm:$0xff]  ;;  %v7589_v36 = vld [vmem:[%s7487_s25 + $0x91] sm:$0xff] }
  0x1c   : > { %6252 = vmatprep.mubr.msk.f32.mxu1 %vm324_vm0, %v2320_v19  ;;  %6556 = vmatprep.mubr.msk.f32.mxu0 %vm324_vm0, %v7509_v25  ;;  %9104 = vst [vmem:[#allocation6_spill] sm:$0xff] %v7578_v35  ;;  %9105 = vst [vmem:[#allocation7_spill] sm:$0xff] %v7589_v36  ;;  %v7592_v37 = vld [vmem:[%s7487_s25 + $0x99] sm:$0xff]  ;;  %v7603_v38 = vld [vmem:[%s7487_s25 + $0xa1] sm:$0xff] }
  0x1d   : > { %9106 = vst [vmem:[#allocation8_spill] sm:$0xff] %v7592_v37  ;;  %9107 = vst [vmem:[#allocation9_spill] sm:$0xff] %v7603_v38  ;;  %v7606_v39 = vld [vmem:[%s7487_s25 + $0xa9] sm:$0xff]  ;;  %v7617_v40 = vld [vmem:[%s7487_s25 + $0xb1] sm:$0xff] }
  0x1e   : > { %9108 = vst [vmem:[#allocation10_spill] sm:$0xff] %v7606_v39  ;;  %9109 = vst [vmem:[#allocation11_spill] sm:$0xff] %v7617_v40  ;;  %v7620_v41 = vld [vmem:[%s7487_s25 + $0xb9] sm:$0xff]  ;;  %v7631_v42 = vld [vmem:[%s7487_s25 + $0xc1] sm:$0xff] }
  0x1f   : > { %6253 = vmatmul.mubr.msk.f32.gmra.mrb[4].mxu1 %vm324_vm0, %v2321_v21  ;;  %6557 = vmatmul.mubr.msk.f32.gmra.mrb[4].mxu0 %vm324_vm0, %v7520_v26  ;;  %9110 = vst [vmem:[#allocation12_spill] sm:$0xff] %v7620_v41  ;;  %9111 = vst [vmem:[#allocation13_spill] sm:$0xff] %v7631_v42  ;;  %v7634_v43 = vld [vmem:[%s7487_s25 + $0xc9] sm:$0xff]  ;;  %v7645_v44 = vld [vmem:[%s7487_s25 + $0xd1] sm:$0xff] }
  0x20   : > { %6255 = vmatprep.mubr.msk.f32.mxu1 %vm324_vm0, %v7504_v24  ;;  %6559 = vmatprep.mubr.msk.f32.mxu0 %vm324_vm0, %v7523_v27  ;;  %9112 = vst [vmem:[#allocation14_spill] sm:$0xff] %v7634_v43  ;;  %9113 = vst [vmem:[#allocation15_spill] sm:$0xff] %v7645_v44  ;;  %v7648_v45 = vld [vmem:[%s7487_s25 + $0x1a] sm:$0xff]  ;;  %v7665_v48 = vld [vmem:[%s7487_s25 + $0x22] sm:$0xff] }
  0x21   : > { %v7670_v50 = vld [vmem:[%s7487_s25 + $0x2a] sm:$0xff]  ;;  %v7680_v51 = vld [vmem:[%s7487_s25 + $0xd9] sm:$0xff]  ;;  %v7688_v53 = vld [vmem:[%s7487_s25 + $0xe1] sm:$0xff] }
  0x22   : > { %9114 = vst [vmem:[#allocation16_spill] sm:$0xff] %v7680_v51  ;;  %v7683_v52 = vld [vmem:[%s7487_s25 + $0x32] sm:$0xff]  ;;  %9115 = vst [vmem:[#allocation17_spill] sm:$0xff] %v7688_v53  ;;  %v7691_v54 = vld [vmem:[%s7487_s25 + $0x3a] sm:$0xff] }
  0x23   : > { %6256 = vmatmul.mubr.msk.f32.gmra.mrb[6].mxu1 %vm324_vm0, %v7509_v25  ;;  %6560 = vmatmul.mubr.msk.f32.gmra.mrb[6].mxu0 %vm324_vm0, %v7533_v28  ;;  %v7703_v55 = vld [vmem:[%s7487_s25 + $0xe9] sm:$0xff]  ;;  %v7709_v57 = vld [vmem:[%s7487_s25 + $0xf1] sm:$0xff]  ;;  %v7723_v59 = vld [vmem:[%s7487_s25 + $0xf9] sm:$0xff] }
  0x24   : > { %6258 = vmatprep.mubr.msk.f32.mxu1 %vm324_vm0, %v7520_v26  ;;  %6562 = vmatprep.mubr.msk.f32.mxu0 %vm324_vm0, %v7536_v29  ;;  %9116 = vst [vmem:[#allocation18_spill] sm:$0xff] %v7703_v55  ;;  %v7706_v56 = vld [vmem:[%s7487_s25 + $0x42] sm:$0xff]  ;;  %9117 = vst [vmem:[#allocation19_spill] sm:$0xff] %v7709_v57  ;;  %v7712_v58 = vld [vmem:[%s7487_s25 + $0x4a] sm:$0xff] }
  0x25   : > { %9118 = vst [vmem:[#allocation20_spill] sm:$0xff] %v7723_v59  ;;  %v7726_v60 = vld [vmem:[%s7487_s25 + $0x52] sm:$0xff]  ;;  %v7729_v61 = vld [vmem:[%s7487_s25 + $0x101] sm:$0xff]  ;;  %v7743_v63 = vld [vmem:[%s7487_s25 + $0x109] sm:$0xff] }
  0x26   : > { %9119 = vst [vmem:[#allocation21_spill] sm:$0xff] %v7729_v61  ;;  %v7732_v62 = vld [vmem:[%s7487_s25 + $0x5a] sm:$0xff]  ;;  %9120 = vst [vmem:[#allocation22_spill] sm:$0xff] %v7743_v63  ;;  %v7746_v0 = vld [vmem:[%s7487_s25 + $0x62] sm:$0xff] }
  0x27   : > { %6259 = vmatmul.mubr.msk.f32.gmra.mrb[8].mxu1 %vm324_vm0, %v7523_v27  ;;  %6563 = vmatmul.mubr.msk.f32.gmra.mrb[8].mxu0 %vm324_vm0, %v7547_v30  ;;  %v7749_v1 = vld [vmem:[%s7487_s25 + $0x111] sm:$0xff]  ;;  %v7763_v3 = vld [vmem:[%s7487_s25 + $0x119] sm:$0xff]  ;;  %v7769_v5 = vld [vmem:[%s7487_s25 + $0x121] sm:$0xff] }
  0x28   : > { %6261 = vmatprep.mubr.msk.f32.mxu1 %vm324_vm0, %v7533_v28  ;;  %6565 = vmatprep.mubr.msk.f32.mxu0 %vm324_vm0, %v7550_v31  ;;  %9121 = vst [vmem:[#allocation23_spill] sm:$0xff] %v7749_v1  ;;  %v7752_v2 = vld [vmem:[%s7487_s25 + $0x6a] sm:$0xff]  ;;  %9122 = vst [vmem:[#allocation24_spill] sm:$0xff] %v7763_v3  ;;  %v7766_v4 = vld [vmem:[%s7487_s25 + $0x72] sm:$0xff] }
  0x29   : > { %9123 = vst [vmem:[#allocation25_spill] sm:$0xff] %v7769_v5  ;;  %v7772_v6 = vld [vmem:[%s7487_s25 + $0x7a] sm:$0xff]  ;;  %v7783_v8 = vld [vmem:[%s7487_s25 + $0x129] sm:$0xff]  ;;  %v7789_v10 = vld [vmem:[%s7487_s25 + $0x131] sm:$0xff] }
  0x2a   : > { %9124 = vst [vmem:[#allocation26_spill] sm:$0xff] %v7783_v8  ;;  %v7786_v9 = vld [vmem:[%s7487_s25 + $0x82] sm:$0xff]  ;;  %9125 = vst [vmem:[#allocation27_spill] sm:$0xff] %v7789_v10  ;;  %v7792_v11 = vld [vmem:[%s7487_s25 + $0x8a] sm:$0xff] }
  0x2b   : > { %6262 = vmatmul.mubr.msk.f32.gmra.mrb[10].mxu1 %vm324_vm0, %v7536_v29  ;;  %6566 = vmatmul.mubr.msk.f32.gmra.mrb[10].mxu0 %vm324_vm0, %v7561_v32  ;;  %v7803_v12 = vld [vmem:[%s7487_s25 + $0x139] sm:$0xff]  ;;  %v7809_v14 = vld [vmem:[%s7487_s25 + $0x141] sm:$0xff]  ;;  %v7823_v16 = vld [vmem:[%s7487_s25 + $0x149] sm:$0xff] }
  0x2c   : > { %6264 = vmatprep.mubr.msk.f32.mxu1 %vm324_vm0, %v7547_v30  ;;  %6568 = vmatprep.mubr.msk.f32.mxu0 %vm324_vm0, %v7564_v33  ;;  %9126 = vst [vmem:[#allocation28_spill] sm:$0xff] %v7803_v12  ;;  %v7806_v13 = vld [vmem:[%s7487_s25 + $0x92] sm:$0xff]  ;;  %9127 = vst [vmem:[#allocation29_spill] sm:$0xff] %v7809_v14  ;;  %v7812_v15 = vld [vmem:[%s7487_s25 + $0x9a] sm:$0xff] }
  0x2d   : > { %9128 = vst [vmem:[#allocation30_spill] sm:$0xff] %v7823_v16  ;;  %v7826_v17 = vld [vmem:[%s7487_s25 + $0xa2] sm:$0xff]  ;;  %v7829_v18 = vld [vmem:[%s7487_s25 + $0x151] sm:$0xff]  ;;  %v7843_v20 = vld [vmem:[%s7487_s25 + $0x159] sm:$0xff] }
  0x2e   : > { %9129 = vst [vmem:[#allocation31_spill] sm:$0xff] %v7829_v18  ;;  %v7832_v19 = vld [vmem:[%s7487_s25 + $0xaa] sm:$0xff]  ;;  %9130 = vst [vmem:[#allocation32_spill] sm:$0xff] %v7843_v20  ;;  %v7846_v21 = vld [vmem:[%s7487_s25 + $0xb2] sm:$0xff] }
  0x2f   : > { %6265 = vmatmul.mubr.msk.f32.gmra.mrb[12].mxu1 %vm324_vm0, %v7550_v31  ;;  %6569 = vmatmul.mubr.msk.f32.gmra.mrb[12].mxu0 %vm324_vm0, %v7575_v34  ;;  %v7852_v46 = vld [vmem:[%s7487_s25 + $0xba] sm:$0xff]  ;;  %v7863_v47 = vld [vmem:[%s7487_s25 + $0x169] sm:$0xff] }
  0x30   : > { %6267 = vmatprep.mubr.msk.f32.mxu1 %vm324_vm0, %v7561_v32  ;;  %6571 = vmatprep.mubr.msk.f32.mxu0 %vm324_vm0, %v7578_v35  ;;  %9132 = vst [vmem:[#allocation34_spill] sm:$0xff] %v7863_v47  ;;  %v5738_v32 = vld [vmem:[%s9022_s1 + $0x80] sm:$0xff] }
  0x33   : > { %6268 = vmatmul.mubr.msk.f32.gmra.mrb[14].mxu1 %vm324_vm0, %v7564_v33  ;;  %6572 = vmatmul.mubr.msk.f32.gmra.mrb[14].mxu0 %vm324_vm0, %v7589_v36  ;;  %v2913_v33 = vld [vmem:[%s7487_s25 + $0x18a] sm:$0xff] }
  0x34   : > { %6270 = vmatprep.mubr.msk.f32.mxu1 %vm324_vm0, %v7575_v34  ;;  %6574 = vmatprep.mubr.msk.f32.mxu0 %vm324_vm0, %v7592_v37  ;;  %v8093_v34 = vld [vmem:[%s7487_s25 + $0x17a] sm:$0xff] }
  0x35   : > { %9166 = vst [vmem:[#allocation68_spill] sm:$0xff] %v8093_v34 }
  0x37   : > { %6271 = vmatmul.mubr.msk.f32.gmra.mrb[16].mxu1 %vm324_vm0, %v7578_v35  ;;  %6575 = vmatmul.mubr.msk.f32.gmra.mrb[16].mxu0 %vm324_vm0, %v7603_v38  ;;  %v8073_v35 = vld [vmem:[%s7487_s25 + $0x16a] sm:$0xff] }
  0x38   : > { %6273 = vmatprep.mubr.msk.f32.mxu1 %vm324_vm0, %v7589_v36  ;;  %6577 = vmatprep.mubr.msk.f32.mxu0 %vm324_vm0, %v7606_v39  ;;  %v8053_v36 = vld [vmem:[%s7487_s25 + $0x15a] sm:$0xff]  ;;  %9162 = vst [vmem:[#allocation64_spill] sm:$0xff] %v8073_v35 }
  0x39   : > { %9158 = vst [vmem:[#allocation60_spill] sm:$0xff] %v8053_v36 }
  0x3b   : > { %6274 = vmatmul.mubr.msk.f32.gmra.mrb[18].mxu1 %vm324_vm0, %v7592_v37  ;;  %6578 = vmatmul.mubr.msk.f32.gmra.mrb[18].mxu0 %vm324_vm0, %v7617_v40  ;;  %v8033_v37 = vld [vmem:[%s7487_s25 + $0x14a] sm:$0xff] }
  0x3c   : > { %6276 = vmatprep.mubr.msk.f32.mxu1 %vm324_vm0, %v7603_v38  ;;  %6580 = vmatprep.mubr.msk.f32.mxu0 %vm324_vm0, %v7620_v41  ;;  %v8030_v38 = vld [vmem:[%s7487_s25 + $0x70] sm:$0xff]  ;;  %9154 = vst [vmem:[#allocation56_spill] sm:$0xff] %v8033_v37 }
  0x3d   : > { %9153 = vst [vmem:[#allocation55_spill] sm:$0xff] %v8030_v38 }
  0x3f   : > { %6277 = vmatmul.mubr.msk.f32.gmra.mrb[20].mxu1 %vm324_vm0, %v7606_v39  ;;  %6581 = vmatmul.mubr.msk.f32.gmra.mrb[20].mxu0 %vm324_vm0, %v7631_v42  ;;  %v8027_v39 = vld [vmem:[%s7487_s25 + $0x142] sm:$0xff] }
  0x40   : > { %6279 = vmatprep.mubr.msk.f32.mxu1 %vm324_vm0, %v7617_v40  ;;  %6583 = vmatprep.mubr.msk.f32.mxu0 %vm324_vm0, %v7634_v43  ;;  %v8024_v40 = vld [vmem:[%s7487_s25 + $0x68] sm:$0xff]  ;;  %9152 = vst [vmem:[#allocation54_spill] sm:$0xff] %v8027_v39 }
  0x41   : > { %9151 = vst [vmem:[#allocation53_spill] sm:$0xff] %v8024_v40 }
  0x43   : > { %6280 = vmatmul.mubr.msk.f32.gmra.mrb[22].mxu1 %vm324_vm0, %v7620_v41  ;;  %6584 = vmatmul.mubr.msk.f32.gmra.mrb[22].mxu0 %vm324_vm0, %v7645_v44  ;;  %v8013_v41 = vld [vmem:[%s7487_s25 + $0x13a] sm:$0xff] }
  0x44   : > { %6282 = vmatprep.mubr.msk.f32.mxu1 %vm324_vm0, %v7631_v42  ;;  %6626 = vmatprep.mubr.msk.f32.mxu0 %vm324_vm0, %v7648_v45  ;;  %v8010_v42 = vld [vmem:[%s7487_s25 + $0x60] sm:$0xff]  ;;  %9150 = vst [vmem:[#allocation52_spill] sm:$0xff] %v8013_v41 }
  0x45   : > { %9149 = vst [vmem:[#allocation51_spill] sm:$0xff] %v8010_v42 }
  0x47   : > { %6283 = vmatmul.mubr.msk.f32.gmra.mrb[24].mxu1 %vm324_vm0, %v7634_v43  ;;  %6627 = vmatmul.mubr.msk.f32.vlgmr.msra.gmra.mrb[0].mxu0 %vm324_vm0, %v7665_v48  ;;  %v8007_v43 = vld [vmem:[%s7487_s25 + $0x132] sm:$0xff] }
  0x48   : > { %6953 = vmatpush3.bf16.msra.mxu0 %v7497_v22  ;;  %6285 = vmatprep.mubr.msk.f32.mxu1 %vm324_vm0, %v7645_v44  ;;  %v7849_v22 = vld [vmem:[%s7487_s25 + $0x161] sm:$0xff]  ;;  %v8004_v44 = vld [vmem:[%s7487_s25 + $0x58] sm:$0xff]  ;;  %9148 = vst [vmem:[#allocation50_spill] sm:$0xff] %v8007_v43 }
  0x49   : > { %6629 = vmatprep.mubr.msk.f32.mxu0 %vm324_vm0, %v7670_v50  ;;  %6955 = vmatprep.subr.bf16.mxu0 %v7667_v49  ;;  %9131 = vst [vmem:[#allocation33_spill] sm:$0xff] %v7849_v22  ;;  %9147 = vst [vmem:[#allocation49_spill] sm:$0xff] %v8004_v44 }
  0x4b   : > { %6286 = vmatmul.mubr.msk.f32.gmra.mrb[26].mxu1 %vm324_vm0, %v7680_v51  ;;  %6630 = vmatmul.mubr.msk.f32.gmra.mrb[2].mxu0 %vm324_vm0, %v7683_v52  ;;  %v7993_v51 = vld [vmem:[%s7487_s25 + $0x12a] sm:$0xff] }
  0x4c   : > { %6288 = vmatprep.mubr.msk.f32.mxu1 %vm324_vm0, %v7688_v53  ;;  %6632 = vmatprep.mubr.msk.f32.mxu0 %vm324_vm0, %v7691_v54  ;;  %v7990_v53 = vld [vmem:[%s7487_s25 + $0x50] sm:$0xff]  ;;  %9146 = vst [vmem:[#allocation48_spill] sm:$0xff] %v7993_v51 }
  0x4d   : > { %9145 = vst [vmem:[#allocation47_spill] sm:$0xff] %v7990_v53 }
  0x4f   : > { %6289 = vmatmul.mubr.msk.f32.gmra.mrb[28].mxu1 %vm324_vm0, %v7703_v55  ;;  %6633 = vmatmul.mubr.msk.f32.gmra.mrb[4].mxu0 %vm324_vm0, %v7706_v56  ;;  %v7987_v55 = vld [vmem:[%s7487_s25 + $0x122] sm:$0xff] }
  0x50   : > { %6291 = vmatprep.mubr.msk.f32.mxu1 %vm324_vm0, %v7709_v57  ;;  %6635 = vmatprep.mubr.msk.f32.mxu0 %vm324_vm0, %v7712_v58  ;;  %v7970_v57 = vld [vmem:[%s7487_s25 + $0x40] sm:$0xff]  ;;  %9144 = vst [vmem:[#allocation46_spill] sm:$0xff] %v7987_v55 }
  0x51   : > { %9141 = vst [vmem:[#allocation43_spill] sm:$0xff] %v7970_v57 }
  0x53   : > { %6292 = vmatmul.mubr.msk.f32.gmra.mrb[30].mxu1 %vm324_vm0, %v7723_v59  ;;  %6636 = vmatmul.mubr.msk.f32.gmra.mrb[6].mxu0 %vm324_vm0, %v7726_v60  ;;  %v7964_v59 = vld [vmem:[%s7487_s25 + $0x38] sm:$0xff] }
  0x54   : > { %6294 = vmatprep.mubr.msk.f32.mxu1 %vm324_vm0, %v7729_v61  ;;  %6638 = vmatprep.mubr.msk.f32.mxu0 %vm324_vm0, %v7732_v62  ;;  %v7953_v61 = vld [vmem:[%s7487_s25 + $0x10a] sm:$0xff] }
  0x55   : > { %9139 = vst [vmem:[#allocation41_spill] sm:$0xff] %v7953_v61 }
  0x57   : > { %6295 = vmatmul.mubr.msk.f32.gmra.mrb[32].mxu1 %vm324_vm0, %v7743_v63  ;;  %6639 = vmatmul.mubr.msk.f32.gmra.mrb[8].mxu0 %vm324_vm0, %v7746_v0  ;;  %v7913_v63 = vld [vmem:[%s7487_s25 + $0xea] sm:$0xff] }
  0x58   : > { %6297 = vmatprep.mubr.msk.f32.mxu1 %vm324_vm0, %v7749_v1  ;;  %6641 = vmatprep.mubr.msk.f32.mxu0 %vm324_vm0, %v7752_v2 }
  0x5b   : > { %6298 = vmatmul.mubr.msk.f32.gmra.mrb[34].mxu1 %vm324_vm0, %v7763_v3  ;;  %6642 = vmatmul.mubr.msk.f32.gmra.mrb[10].mxu0 %vm324_vm0, %v7766_v4  ;;  %v225_v3 = vld [vmem:[%s7487_s25 + $0x10] sm:$0xff] }
  0x5c   : > { %6300 = vmatprep.mubr.msk.f32.mxu1 %vm324_vm0, %v7769_v5  ;;  %6644 = vmatprep.mubr.msk.f32.mxu0 %vm324_vm0, %v7772_v6  ;;  %v7907_v5 = vld [vmem:[%s7487_s25 + $0xe2] sm:$0xff] }
  0x5f   : > { %6301 = vmatmul.mubr.msk.f32.gmra.mrb[36].mxu1 %vm324_vm0, %v7783_v8  ;;  %6645 = vmatmul.mubr.msk.f32.gmra.mrb[12].mxu0 %vm324_vm0, %v7786_v9  ;;  %v224_v8 = vld [vmem:[%s7487_s25 + $0x8] sm:$0xff] }
  0x60   : > { %6303 = vmatprep.mubr.msk.f32.mxu1 %vm324_vm0, %v7789_v10  ;;  %6647 = vmatprep.mubr.msk.f32.mxu0 %vm324_vm0, %v7792_v11  ;;  %v7890_v10 = vld [vmem:[%s7487_s25 + $0xda] sm:$0xff] }
  0x63   : > { %6304 = vmatmul.mubr.msk.f32.gmra.mrb[38].mxu1 %vm324_vm0, %v7803_v12  ;;  %6648 = vmatmul.mubr.msk.f32.gmra.mrb[14].mxu0 %vm324_vm0, %v7806_v13  ;;  %v223_v12 = vld [vmem:[%s7487_s25] sm:$0xff] }
  0x64   : > { %6306 = vmatprep.mubr.msk.f32.mxu1 %vm324_vm0, %v7809_v14  ;;  %6650 = vmatprep.mubr.msk.f32.mxu0 %vm324_vm0, %v7812_v15  ;;  %v7872_v14 = vld [vmem:[%s7487_s25 + $0xca] sm:$0xff] }
  0x67   : > { %6307 = vmatmul.mubr.msk.f32.gmra.mrb[40].mxu1 %vm324_vm0, %v7823_v16  ;;  %6651 = vmatmul.mubr.msk.f32.gmra.mrb[16].mxu0 %vm324_vm0, %v7826_v17  ;;  %v7869_v16 = vld [vmem:[%s7487_s25 + $0x171] sm:$0xff] }
  0x68   : > { %6309 = vmatprep.mubr.msk.f32.mxu1 %vm324_vm0, %v7829_v18  ;;  %6653 = vmatprep.mubr.msk.f32.mxu0 %vm324_vm0, %v7832_v19  ;;  %v7866_v18 = vld [vmem:[%s7487_s25 + $0xc2] sm:$0xff]  ;;  %9133 = vst [vmem:[#allocation35_spill] sm:$0xff] %v7869_v16 }
  0x6b   : > { %6310 = vmatmul.mubr.msk.f32.gmra.mrb[42].mxu1 %vm324_vm0, %v7843_v20  ;;  %6654 = vmatmul.mubr.msk.f32.gmra.mrb[18].mxu0 %vm324_vm0, %v7846_v21  ;;  %v7886_v20 = vld [vmem:[%s7487_s25 + $0xd2] sm:$0xff] }
  0x6c   : > { %6312 = vmatprep.mubr.msk.f32.mxu1 %vm324_vm0, %v7849_v22  ;;  %6656 = vmatprep.mubr.msk.f32.mxu0 %vm324_vm0, %v7852_v46  ;;  %v7883_v22 = vld [vmem:[%s7487_s25 + $0x179] sm:$0xff] }
  0x6d   : > { %9134 = vst [vmem:[#allocation36_spill] sm:$0xff] %v7883_v22 }
  0x6f   : > { %6313 = vmatmul.mubr.msk.f32.gmra.mrb[44].mxu1 %vm324_vm0, %v7863_v47  ;;  %6657 = vmatmul.mubr.msk.f32.gmra.mrb[20].mxu0 %vm324_vm0, %v7866_v18  ;;  %v5488_v47 = vld [vmem:[%s9022_s1 + $0x30] sm:$0xff] }
  0x70   : > { %6315 = vmatprep.mubr.msk.f32.mxu1 %vm324_vm0, %v7869_v16  ;;  %6659 = vmatprep.mubr.msk.f32.mxu0 %vm324_vm0, %v7872_v14  ;;  %v5489_v16 = vld [vmem:[%s9022_s1 + $0x38] sm:$0xff] }
  0x71   : > { %v7910_v1 = vpack.c.bf16 %v5489_v16, %v5488_v47  ;;  %v7929_v16 = vld [vmem:[%s7487_s25 + $0x20] sm:$0xff]  ;;  %v7950_v47 = vld [vmem:[%s7487_s25 + $0x30] sm:$0xff] }
  0x72   : > { %9136 = vst [vmem:[#allocation38_spill] sm:$0xff] %v7929_v16 }
  0x73   : > { %6316 = vmatmul.mubr.msk.f32.gmra.mrb[46].mxu1 %vm324_vm0, %v7883_v22  ;;  %6660 = vmatmul.mubr.msk.f32.gmra.mrb[22].mxu0 %vm324_vm0, %v7886_v20  ;;  %v7924_v22 = vld [vmem:[%s7487_s25 + $0xf2] sm:$0xff] }
  0x74   : > { %6322 = vmatprep.mubr.msk.f32.mxu1 %vm324_vm0, %v223_v12  ;;  %6662 = vmatprep.mubr.msk.f32.mxu0 %vm324_vm0, %v7890_v10  ;;  %v7921_v12 = vld [vmem:[%s7487_s25 + $0x18] sm:$0xff] }
  0x75   : > { %9135 = vst [vmem:[#allocation37_spill] sm:$0xff] %v7921_v12 }
  0x77   : > { %6323 = vmatmul.mubr.msk.f32.vlgmr.msra.gmra.mrb[0].mxu1 %vm324_vm0, %v224_v8  ;;  %6663 = vmatmul.mubr.msk.f32.gmra.mrb[24].mxu0 %vm324_vm0, %v7907_v5  ;;  %v7932_v8 = vld [vmem:[%s7487_s25 + $0xfa] sm:$0xff] }
  0x78   : > { %6937 = vmatpush3.bf16.msra.mxu1 %v7499_v23  ;;  %6325 = vmatprep.mubr.msk.f32.mxu1 %vm324_vm0, %v225_v3  ;;  %v7944_v23 = vld [vmem:[%s7487_s25 + $0x28] sm:$0xff] }
  0x79   : > { %6665 = vmatprep.mubr.msk.f32.mxu0 %vm324_vm0, %v7913_v63  ;;  %6939 = vmatprep.subr.bf16.mxu1 %v7910_v1  ;;  %9137 = vst [vmem:[#allocation39_spill] sm:$0xff] %v7944_v23  ;;  %v7947_v3 = vld [vmem:[%s7487_s25 + $0x102] sm:$0xff] }
  0x7a   : > { %9138 = vst [vmem:[#allocation40_spill] sm:$0xff] %v7947_v3 }
  0x7b   : > { %6326 = vmatmul.mubr.msk.f32.gmra.mrb[2].mxu1 %vm324_vm0, %v7921_v12  ;;  %6666 = vmatmul.mubr.msk.f32.gmra.mrb[26].mxu0 %vm324_vm0, %v7924_v22  ;;  %v7973_v12 = vld [vmem:[%s7487_s25 + $0x11a] sm:$0xff] }
  0x7c   : > { %6328 = vmatprep.mubr.msk.f32.mxu1 %vm324_vm0, %v7929_v16  ;;  %6668 = vmatprep.mubr.msk.f32.mxu0 %vm324_vm0, %v7932_v8  ;;  %v7967_v16 = vld [vmem:[%s7487_s25 + $0x112] sm:$0xff]  ;;  %9142 = vst [vmem:[#allocation44_spill] sm:$0xff] %v7973_v12 }
  0x7d   : > { %9140 = vst [vmem:[#allocation42_spill] sm:$0xff] %v7967_v16 }
  0x7f   : > { %6329 = vmatmul.mubr.msk.f32.gmra.mrb[4].mxu1 %vm324_vm0, %v7944_v23  ;;  %6669 = vmatmul.mubr.msk.f32.gmra.mrb[28].mxu0 %vm324_vm0, %v7947_v3  ;;  %v7984_v23 = vld [vmem:[%s7487_s25 + $0x48] sm:$0xff]  ;;  %v8141_v3 = vld [vmem:[%s7487_s25 + $0xd0] sm:$0xff] }
  0x80   : > { %6331 = vmatprep.mubr.msk.f32.mxu1 %vm324_vm0, %v7950_v47  ;;  %6671 = vmatprep.mubr.msk.f32.mxu0 %vm324_vm0, %v7953_v61  ;;  %9143 = vst [vmem:[#allocation45_spill] sm:$0xff] %v7984_v23  ;;  %v8122_v61 = vld [vmem:[%s7487_s25 + $0xc0] sm:$0xff]  ;;  %9172 = vst [vmem:[#allocation74_spill] sm:$0xff] %v8141_v3 }
  0x81   : > { %9170 = vst [vmem:[#allocation72_spill] sm:$0xff] %v8122_v61 }
  0x83   : > { %6332 = vmatmul.mubr.msk.f32.gmra.mrb[6].mxu1 %vm324_vm0, %v7964_v59  ;;  %6672 = vmatmul.mubr.msk.f32.gmra.mrb[30].mxu0 %vm324_vm0, %v7967_v16  ;;  %v8108_v16 = vld [vmem:[%s7487_s25 + $0xb0] sm:$0xff] }
  0x84   : > { %6334 = vmatprep.mubr.msk.f32.mxu1 %vm324_vm0, %v7970_v57  ;;  %6674 = vmatprep.mubr.msk.f32.mxu0 %vm324_vm0, %v7973_v12  ;;  %v8090_v12 = vld [vmem:[%s7487_s25 + $0xa0] sm:$0xff]  ;;  %9168 = vst [vmem:[#allocation70_spill] sm:$0xff] %v8108_v16 }
  0x85   : > { %9165 = vst [vmem:[#allocation67_spill] sm:$0xff] %v8090_v12 }
  0x87   : > { %6335 = vmatmul.mubr.msk.f32.gmra.mrb[8].mxu1 %vm324_vm0, %v7984_v23  ;;  %6675 = vmatmul.mubr.msk.f32.gmra.mrb[32].mxu0 %vm324_vm0, %v7987_v55  ;;  %v8070_v55 = vld [vmem:[%s7487_s25 + $0x90] sm:$0xff] }
  0x88   : > { %6337 = vmatprep.mubr.msk.f32.mxu1 %vm324_vm0, %v7990_v53  ;;  %6677 = vmatprep.mubr.msk.f32.mxu0 %vm324_vm0, %v7993_v51  ;;  %v8050_v51 = vld [vmem:[%s7487_s25 + $0x80] sm:$0xff]  ;;  %9161 = vst [vmem:[#allocation63_spill] sm:$0xff] %v8070_v55 }
  0x89   : > { %9157 = vst [vmem:[#allocation59_spill] sm:$0xff] %v8050_v51 }
  0x8b   : > { %6338 = vmatmul.mubr.msk.f32.gmra.mrb[10].mxu1 %vm324_vm0, %v8004_v44  ;;  %6678 = vmatmul.mubr.msk.f32.gmra.mrb[34].mxu0 %vm324_vm0, %v8007_v43  ;;  %v8047_v43 = vld [vmem:[%s7487_s25 + $0x152] sm:$0xff] }
  0x8c   : > { %6340 = vmatprep.mubr.msk.f32.mxu1 %vm324_vm0, %v8010_v42  ;;  %6680 = vmatprep.mubr.msk.f32.mxu0 %vm324_vm0, %v8013_v41  ;;  %v8044_v41 = vld [vmem:[%s7487_s25 + $0x78] sm:$0xff]  ;;  %9156 = vst [vmem:[#allocation58_spill] sm:$0xff] %v8047_v43 }
  0x8d   : > { %9155 = vst [vmem:[#allocation57_spill] sm:$0xff] %v8044_v41 }
  0x8f   : > { %6341 = vmatmul.mubr.msk.f32.gmra.mrb[12].mxu1 %vm324_vm0, %v8024_v40  ;;  %6681 = vmatmul.mubr.msk.f32.gmra.mrb[36].mxu0 %vm324_vm0, %v8027_v39  ;;  %v8067_v39 = vld [vmem:[%s7487_s25 + $0x162] sm:$0xff] }
  0x90   : > { %6343 = vmatprep.mubr.msk.f32.mxu1 %vm324_vm0, %v8030_v38  ;;  %6683 = vmatprep.mubr.msk.f32.mxu0 %vm324_vm0, %v8033_v37  ;;  %v8064_v37 = vld [vmem:[%s7487_s25 + $0x88] sm:$0xff]  ;;  %9160 = vst [vmem:[#allocation62_spill] sm:$0xff] %v8067_v39 }
  0x91   : > { %9159 = vst [vmem:[#allocation61_spill] sm:$0xff] %v8064_v37 }
  0x93   : > { %6344 = vmatmul.mubr.msk.f32.gmra.mrb[14].mxu1 %vm324_vm0, %v8044_v41  ;;  %6684 = vmatmul.mubr.msk.f32.gmra.mrb[38].mxu0 %vm324_vm0, %v8047_v43  ;;  %v8087_v43 = vld [vmem:[%s7487_s25 + $0x172] sm:$0xff] }
  0x94   : > { %6346 = vmatprep.mubr.msk.f32.mxu1 %vm324_vm0, %v8050_v51  ;;  %6686 = vmatprep.mubr.msk.f32.mxu0 %vm324_vm0, %v8053_v36  ;;  %v8084_v36 = vld [vmem:[%s7487_s25 + $0x98] sm:$0xff]  ;;  %9164 = vst [vmem:[#allocation66_spill] sm:$0xff] %v8087_v43 }
  0x95   : > { %9163 = vst [vmem:[#allocation65_spill] sm:$0xff] %v8084_v36 }
  0x97   : > { %6347 = vmatmul.mubr.msk.f32.gmra.mrb[16].mxu1 %vm324_vm0, %v8064_v37  ;;  %6687 = vmatmul.mubr.msk.f32.gmra.mrb[40].mxu0 %vm324_vm0, %v8067_v39  ;;  %v2912_v39 = vld [vmem:[%s7487_s25 + $0x182] sm:$0xff] }
  0x98   : > { %6349 = vmatprep.mubr.msk.f32.mxu1 %vm324_vm0, %v8070_v55  ;;  %6689 = vmatprep.mubr.msk.f32.mxu0 %vm324_vm0, %v8073_v35  ;;  %v8104_v35 = vld [vmem:[%s7487_s25 + $0xa8] sm:$0xff] }
  0x99   : > { %9167 = vst [vmem:[#allocation69_spill] sm:$0xff] %v8104_v35 }
  0x9b   : > { %6350 = vmatmul.mubr.msk.f32.gmra.mrb[18].mxu1 %vm324_vm0, %v8084_v36  ;;  %6690 = vmatmul.mubr.msk.f32.gmra.mrb[42].mxu0 %vm324_vm0, %v8087_v43  ;;  %v8118_v43 = vld [vmem:[%s7487_s25 + $0xb8] sm:$0xff] }
  0x9c   : > { %6352 = vmatprep.mubr.msk.f32.mxu1 %vm324_vm0, %v8090_v12  ;;  %6692 = vmatprep.mubr.msk.f32.mxu0 %vm324_vm0, %v8093_v34  ;;  %9169 = vst [vmem:[#allocation71_spill] sm:$0xff] %v8118_v43  ;;  %v2914_v34 = vld [vmem:[%s7487_s25 + $0x192] sm:$0xff] }
  0x9f   : > { %6353 = vmatmul.mubr.msk.f32.gmra.mrb[20].mxu1 %vm324_vm0, %v8104_v35  ;;  %6693 = vmatmul.mubr.msk.f32.gmra.mrb[44].mxu0 %vm324_vm0, %v2912_v39  ;;  %v5739_v39 = vld [vmem:[%s9022_s1 + $0x88] sm:$0xff] }
  0xa0   : > { %6355 = vmatprep.mubr.msk.f32.mxu1 %vm324_vm0, %v8108_v16  ;;  %6695 = vmatprep.mubr.msk.f32.mxu0 %vm324_vm0, %v2913_v33  ;;  %v8138_v33 = vld [vmem:[%s7487_s25 + $0xc8] sm:$0xff]  ;;  %v8143_v31 = vpack.c.bf16 %v5739_v39, %v5738_v32  ;;  %v8158_v32 = vld [vmem:[%s7487_s25 + $0xe0] sm:$0xff]  ;;  %v8173_v39 = vld [vmem:[%s7487_s25 + $0xf0] sm:$0xff] }
  0xa1   : > { %9171 = vst [vmem:[#allocation73_spill] sm:$0xff] %v8138_v33 }
  0xa3   : > { %6356 = vmatmul.mubr.msk.f32.gmra.mrb[22].mxu1 %vm324_vm0, %v8118_v43  ;;  %6696 = vmatmul.mubr.msk.f32.gmra.mrb[46].mxu0 %vm324_vm0, %v2914_v34  ;;  %v8153_v34 = vld [vmem:[%s7487_s25 + $0xd8] sm:$0xff] }
  0xa4   : > { %6358 = vmatprep.mubr.msk.f32.mxu1 %vm324_vm0, %v8122_v61  ;;  %6702 = vmatprep.mubr.msk.f32.mxu0 %vm324_vm0, %v7950_v47  ;;  %9173 = vst [vmem:[#allocation75_spill] sm:$0xff] %v8153_v34 }
  0xa7   : > { %6359 = vmatmul.mubr.msk.f32.gmra.mrb[24].mxu1 %vm324_vm0, %v8138_v33  ;;  %6703 = vmatmul.mubr.msk.f32.vlgmr.msra.gmra.mrb[0].mxu0 %vm324_vm0, %v7964_v59 }
  0xa8   : > { %6957 = vmatpush3.bf16.msra.mxu0 %v7667_v49  ;;  %6361 = vmatprep.mubr.msk.f32.mxu1 %vm324_vm0, %v8141_v3  ;;  %v8170_v49 = vld [vmem:[%s7487_s25 + $0xe8] sm:$0xff] }
  0xa9   : > { %6705 = vmatprep.mubr.msk.f32.mxu0 %vm324_vm0, %v7970_v57  ;;  %6959 = vmatprep.subr.bf16.mxu0 %v8143_v31  ;;  %v1223_v57 = vld [vmem:[%s7487_s25 + $0x2] sm:$0xff] }
  0xab   : > { %6362 = vmatmul.mubr.msk.f32.gmra.mrb[26].mxu1 %vm324_vm0, %v8153_v34  ;;  %6706 = vmatmul.mubr.msk.f32.gmra.mrb[2].mxu0 %vm324_vm0, %v7984_v23  ;;  %v8184_v23 = vld [vmem:[%s7487_s25 + $0xf8] sm:$0xff] }
  0xac   : > { %6364 = vmatprep.mubr.msk.f32.mxu1 %vm324_vm0, %v8158_v32  ;;  %6708 = vmatprep.mubr.msk.f32.mxu0 %vm324_vm0, %v7990_v53  ;;  %v8187_v53 = vld [vmem:[%s7487_s25 + $0x100] sm:$0xff] }
  0xaf   : > { %6365 = vmatmul.mubr.msk.f32.gmra.mrb[28].mxu1 %vm324_vm0, %v8170_v49  ;;  %6709 = vmatmul.mubr.msk.f32.gmra.mrb[4].mxu0 %vm324_vm0, %v8004_v44  ;;  %v8198_v44 = vld [vmem:[%s7487_s25 + $0x108] sm:$0xff] }
  0xb0   : > { %6367 = vmatprep.mubr.msk.f32.mxu1 %vm324_vm0, %v8173_v39  ;;  %6711 = vmatprep.mubr.msk.f32.mxu0 %vm324_vm0, %v8010_v42  ;;  %v8201_v42 = vld [vmem:[%s7487_s25 + $0x110] sm:$0xff] }
  0xb3   : > { %6368 = vmatmul.mubr.msk.f32.gmra.mrb[30].mxu1 %vm324_vm0, %v8184_v23  ;;  %6712 = vmatmul.mubr.msk.f32.gmra.mrb[6].mxu0 %vm324_vm0, %v8024_v40  ;;  %v8212_v40 = vld [vmem:[%s7487_s25 + $0x118] sm:$0xff] }
  0xb4   : > { %6370 = vmatprep.mubr.msk.f32.mxu1 %vm324_vm0, %v8187_v53  ;;  %6714 = vmatprep.mubr.msk.f32.mxu0 %vm324_vm0, %v8030_v38  ;;  %v8215_v38 = vld [vmem:[%s7487_s25 + $0x120] sm:$0xff] }
  0xb7   : > { %6371 = vmatmul.mubr.msk.f32.gmra.mrb[32].mxu1 %vm324_vm0, %v8198_v44  ;;  %6715 = vmatmul.mubr.msk.f32.gmra.mrb[8].mxu0 %vm324_vm0, %v8044_v41  ;;  %v8226_v41 = vld [vmem:[%s7487_s25 + $0x128] sm:$0xff] }
  0xb8   : > { %6373 = vmatprep.mubr.msk.f32.mxu1 %vm324_vm0, %v8201_v42  ;;  %6717 = vmatprep.mubr.msk.f32.mxu0 %vm324_vm0, %v8050_v51  ;;  %v8229_v51 = vld [vmem:[%s7487_s25 + $0x130] sm:$0xff] }
  0xbb   : > { %6374 = vmatmul.mubr.msk.f32.gmra.mrb[34].mxu1 %vm324_vm0, %v8212_v40  ;;  %6718 = vmatmul.mubr.msk.f32.gmra.mrb[10].mxu0 %vm324_vm0, %v8064_v37  ;;  %v8240_v37 = vld [vmem:[%s7487_s25 + $0x138] sm:$0xff] }
  0xbc   : > { %6376 = vmatprep.mubr.msk.f32.mxu1 %vm324_vm0, %v8215_v38  ;;  %6720 = vmatprep.mubr.msk.f32.mxu0 %vm324_vm0, %v8070_v55  ;;  %v8243_v55 = vld [vmem:[%s7487_s25 + $0x140] sm:$0xff] }
  0xbf   : > { %6377 = vmatmul.mubr.msk.f32.gmra.mrb[36].mxu1 %vm324_vm0, %v8226_v41  ;;  %6721 = vmatmul.mubr.msk.f32.gmra.mrb[12].mxu0 %vm324_vm0, %v8084_v36  ;;  %v8254_v36 = vld [vmem:[%s7487_s25 + $0x148] sm:$0xff] }
  0xc0   : > { %6379 = vmatprep.mubr.msk.f32.mxu1 %vm324_vm0, %v8229_v51  ;;  %6723 = vmatprep.mubr.msk.f32.mxu0 %vm324_vm0, %v8090_v12  ;;  %v8257_v12 = vld [vmem:[%s7487_s25 + $0x150] sm:$0xff] }
  0xc3   : > { %6380 = vmatmul.mubr.msk.f32.gmra.mrb[38].mxu1 %vm324_vm0, %v8240_v37  ;;  %6724 = vmatmul.mubr.msk.f32.gmra.mrb[14].mxu0 %vm324_vm0, %v8104_v35  ;;  %v8268_v35 = vld [vmem:[%s7487_s25 + $0x158] sm:$0xff] }
  0xc4   : > { %6382 = vmatprep.mubr.msk.f32.mxu1 %vm324_vm0, %v8243_v55  ;;  %6726 = vmatprep.mubr.msk.f32.mxu0 %vm324_vm0, %v8108_v16  ;;  %v8271_v16 = vld [vmem:[%s7487_s25 + $0x160] sm:$0xff] }
  0xc7   : > { %6383 = vmatmul.mubr.msk.f32.gmra.mrb[40].mxu1 %vm324_vm0, %v8254_v36  ;;  %6727 = vmatmul.mubr.msk.f32.gmra.mrb[16].mxu0 %vm324_vm0, %v8118_v43  ;;  %v8282_v43 = vld [vmem:[%s7487_s25 + $0x168] sm:$0xff] }
  0xc8   : > { %6385 = vmatprep.mubr.msk.f32.mxu1 %vm324_vm0, %v8257_v12  ;;  %6729 = vmatprep.mubr.msk.f32.mxu0 %vm324_vm0, %v8122_v61  ;;  %v8285_v61 = vld [vmem:[%s7487_s25 + $0x170] sm:$0xff] }
  0xcb   : > { %6386 = vmatmul.mubr.msk.f32.gmra.mrb[42].mxu1 %vm324_vm0, %v8268_v35  ;;  %6730 = vmatmul.mubr.msk.f32.gmra.mrb[18].mxu0 %vm324_vm0, %v8138_v33  ;;  %v8296_v33 = vld [vmem:[%s7487_s25 + $0x178] sm:$0xff] }
  0xcc   : > { %6388 = vmatprep.mubr.msk.f32.mxu1 %vm324_vm0, %v8271_v16  ;;  %6732 = vmatprep.mubr.msk.f32.mxu0 %vm324_vm0, %v8141_v3  ;;  %v1225_v3 = vld [vmem:[%s7487_s25 + $0x12] sm:$0xff] }
  0xcf   : > { %6389 = vmatmul.mubr.msk.f32.gmra.mrb[44].mxu1 %vm324_vm0, %v8282_v43  ;;  %6733 = vmatmul.mubr.msk.f32.gmra.mrb[20].mxu0 %vm324_vm0, %v8153_v34  ;;  %v1224_v34 = vld [vmem:[%s7487_s25 + $0xa] sm:$0xff] }
  0xd0   : > { %6391 = vmatprep.mubr.msk.f32.mxu1 %vm324_vm0, %v8285_v61  ;;  %6735 = vmatprep.mubr.msk.f32.mxu0 %vm324_vm0, %v8158_v32 }
  0xd3   : > { %6392 = vmatmul.mubr.msk.f32.gmra.mrb[46].mxu1 %vm324_vm0, %v8296_v33  ;;  %6736 = vmatmul.mubr.msk.f32.gmra.mrb[22].mxu0 %vm324_vm0, %v8170_v49 }
  0xd4   : > { %6398 = vmatprep.mubr.msk.f32.mxu1 %vm324_vm0, %v1223_v57  ;;  %6738 = vmatprep.mubr.msk.f32.mxu0 %vm324_vm0, %v8173_v39  ;;  %v9182_v57 = vld [vmem:[#allocation6_spill] sm:$0xff] }
  0xd7   : > { %6399 = vmatmul.mubr.msk.f32.vlgmr.msra.gmra.mrb[0].mxu1 %vm324_vm0, %v1224_v34  ;;  %6739 = vmatmul.mubr.msk.f32.gmra.mrb[24].mxu0 %vm324_vm0, %v8184_v23  ;;  %v9208_v34 = vld [vmem:[#allocation19_spill] sm:$0xff] }
  0xd8   : > { %6941 = vmatpush3.bf16.msra.mxu1 %v7910_v1  ;;  %6401 = vmatprep.mubr.msk.f32.mxu1 %vm324_vm0, %v1225_v3  ;;  %v9188_v1 = vld [vmem:[#allocation9_spill] sm:$0xff] }
  0xd9   : > { %6741 = vmatprep.mubr.msk.f32.mxu0 %vm324_vm0, %v8187_v53  ;;  %6962 = vmatprep.subr.bf16.mxu1 %v7461_v7  ;;  %v9207_v3 = vld [vmem:[#allocation37_spill] sm:$0xff] }
  0xdb   : > { %6402 = vmatmul.mubr.msk.f32.gmra.mrb[2].mxu1 %vm324_vm0, %v7648_v45  ;;  %6742 = vmatmul.mubr.msk.f32.gmra.mrb[26].mxu0 %vm324_vm0, %v8198_v44  ;;  %v8373_v45 = vld [vmem:[%s7487_s25 + $0x180] sm:$0xff] }
  0xdc   : > { %6404 = vmatprep.mubr.msk.f32.mxu1 %vm324_vm0, %v7665_v48  ;;  %6744 = vmatprep.mubr.msk.f32.mxu0 %vm324_vm0, %v8201_v42  ;;  %v8384_v48 = vld [vmem:[%s7487_s25 + $0x188] sm:$0xff] }
  0xdf   : > { %6405 = vmatmul.mubr.msk.f32.gmra.mrb[4].mxu1 %vm324_vm0, %v7670_v50  ;;  %6745 = vmatmul.mubr.msk.f32.gmra.mrb[28].mxu0 %vm324_vm0, %v8212_v40  ;;  %v8387_v50 = vld [vmem:[%s7487_s25 + $0x190] sm:$0xff] }
  0xe0   : > { %6407 = vmatprep.mubr.msk.f32.mxu1 %vm324_vm0, %v7683_v52  ;;  %6747 = vmatprep.mubr.msk.f32.mxu0 %vm324_vm0, %v8215_v38  ;;  %v3460_v52 = vld [vmem:[%s7487_s25 + $0x198] sm:$0xff] }
  0xe3   : > { %6408 = vmatmul.mubr.msk.f32.gmra.mrb[6].mxu1 %vm324_vm0, %v7691_v54  ;;  %6748 = vmatmul.mubr.msk.f32.gmra.mrb[30].mxu0 %vm324_vm0, %v8226_v41  ;;  %v3461_v54 = vld [vmem:[%s7487_s25 + $0x1a0] sm:$0xff] }
  0xe4   : > { %6410 = vmatprep.mubr.msk.f32.mxu1 %vm324_vm0, %v7706_v56  ;;  %6750 = vmatprep.mubr.msk.f32.mxu0 %vm324_vm0, %v8229_v51  ;;  %v3462_v56 = vld [vmem:[%s7487_s25 + $0x1a8] sm:$0xff] }
  0xe7   : > { %6411 = vmatmul.mubr.msk.f32.gmra.mrb[8].mxu1 %vm324_vm0, %v7712_v58  ;;  %6751 = vmatmul.mubr.msk.f32.gmra.mrb[32].mxu0 %vm324_vm0, %v8240_v37  ;;  %v9183_v58 = vld [vmem:[#allocation46_spill] sm:$0xff] }
  0xe8   : > { %6413 = vmatprep.mubr.msk.f32.mxu1 %vm324_vm0, %v7726_v60  ;;  %6753 = vmatprep.mubr.msk.f32.mxu0 %vm324_vm0, %v8243_v55  ;;  %v9184_v60 = vld [vmem:[#allocation7_spill] sm:$0xff] }
  0xeb   : > { %6414 = vmatmul.mubr.msk.f32.gmra.mrb[10].mxu1 %vm324_vm0, %v7732_v62  ;;  %6754 = vmatmul.mubr.msk.f32.gmra.mrb[34].mxu0 %vm324_vm0, %v8254_v36  ;;  %v9185_v62 = vld [vmem:[#allocation48_spill] sm:$0xff] }
  0xec   : > { %6416 = vmatprep.mubr.msk.f32.mxu1 %vm324_vm0, %v7746_v0  ;;  %6756 = vmatprep.mubr.msk.f32.mxu0 %vm324_vm0, %v8257_v12  ;;  %v9187_v0 = vld [vmem:[#allocation50_spill] sm:$0xff] }
  0xef   : > { %6417 = vmatmul.mubr.msk.f32.gmra.mrb[12].mxu1 %vm324_vm0, %v7752_v2  ;;  %6757 = vmatmul.mubr.msk.f32.gmra.mrb[36].mxu0 %vm324_vm0, %v8268_v35  ;;  %v9189_v2 = vld [vmem:[#allocation52_spill] sm:$0xff] }
  0xf0   : > { %6419 = vmatprep.mubr.msk.f32.mxu1 %vm324_vm0, %v7766_v4  ;;  %6759 = vmatprep.mubr.msk.f32.mxu0 %vm324_vm0, %v8271_v16  ;;  %v9190_v4 = vld [vmem:[#allocation10_spill] sm:$0xff] }
  0xf3   : > { %6420 = vmatmul.mubr.msk.f32.gmra.mrb[14].mxu1 %vm324_vm0, %v7772_v6  ;;  %6760 = vmatmul.mubr.msk.f32.gmra.mrb[38].mxu0 %vm324_vm0, %v8282_v43  ;;  %v9192_v6 = vld [vmem:[#allocation11_spill] sm:$0xff] }
  0xf4   : > { %6422 = vmatprep.mubr.msk.f32.mxu1 %vm324_vm0, %v7786_v9  ;;  %6762 = vmatprep.mubr.msk.f32.mxu0 %vm324_vm0, %v8285_v61  ;;  %v9193_v9 = vld [vmem:[#allocation56_spill] sm:$0xff] }
  0xf7   : > { %6423 = vmatmul.mubr.msk.f32.gmra.mrb[16].mxu1 %vm324_vm0, %v7792_v11  ;;  %6763 = vmatmul.mubr.msk.f32.gmra.mrb[40].mxu0 %vm324_vm0, %v8296_v33  ;;  %v9195_v11 = vld [vmem:[#allocation58_spill] sm:$0xff] }
  0xf8   : > { %6425 = vmatprep.mubr.msk.f32.mxu1 %vm324_vm0, %v7806_v13  ;;  %6765 = vmatprep.mubr.msk.f32.mxu0 %vm324_vm0, %v8373_v45  ;;  %v9196_v13 = vld [vmem:[#allocation13_spill] sm:$0xff] }
  0xfb   : > { %6426 = vmatmul.mubr.msk.f32.gmra.mrb[18].mxu1 %vm324_vm0, %v7812_v15  ;;  %6766 = vmatmul.mubr.msk.f32.gmra.mrb[42].mxu0 %vm324_vm0, %v8384_v48  ;;  %v9198_v15 = vld [vmem:[#allocation14_spill] sm:$0xff] }
  0xfc   : > { %6428 = vmatprep.mubr.msk.f32.mxu1 %vm324_vm0, %v7826_v17  ;;  %6768 = vmatprep.mubr.msk.f32.mxu0 %vm324_vm0, %v8387_v50  ;;  %v9199_v17 = vld [vmem:[#allocation62_spill] sm:$0xff] }
  0xff   : > { %6429 = vmatmul.mubr.msk.f32.gmra.mrb[20].mxu1 %vm324_vm0, %v7832_v19  ;;  %6769 = vmatmul.mubr.msk.f32.gmra.mrb[44].mxu0 %vm324_vm0, %v3460_v52  ;;  %v9201_v19 = vld [vmem:[#allocation64_spill] sm:$0xff]  ;;  %v9209_v52 = vld [vmem:[#allocation38_spill] sm:$0xff] }
 0x100   : > { %6431 = vmatprep.mubr.msk.f32.mxu1 %vm324_vm0, %v7846_v21  ;;  %6771 = vmatprep.mubr.msk.f32.mxu0 %vm324_vm0, %v3461_v54  ;;  %v9203_v21 = vld [vmem:[#allocation66_spill] sm:$0xff]  ;;  %v9210_v54 = vld [vmem:[#allocation20_spill] sm:$0xff] }
 0x103   : > { %6432 = vmatmul.mubr.msk.f32.gmra.mrb[22].mxu1 %vm324_vm0, %v7852_v46  ;;  %6772 = vmatmul.mubr.msk.f32.gmra.mrb[46].mxu0 %vm324_vm0, %v3462_v56  ;;  %v9205_v46 = vld [vmem:[#allocation68_spill] sm:$0xff]  ;;  %v9211_v56 = vld [vmem:[#allocation39_spill] sm:$0xff] }
 0x104   : > { %6434 = vmatprep.mubr.msk.f32.mxu1 %vm324_vm0, %v7866_v18  ;;  %6778 = vmatprep.mubr.msk.f32.mxu0 %vm324_vm0, %v7504_v24  ;;  %v9174_v24 = vld [vmem:[#allocation2_spill] sm:$0xff]  ;;  %v9200_v18 = vld [vmem:[#allocation15_spill] sm:$0xff] }
 0x107   : > { %6435 = vmatmul.mubr.msk.f32.gmra.mrb[24].mxu1 %vm324_vm0, %v7872_v14  ;;  %6779 = vmatmul.mubr.msk.f32.vlgmr.msra.gmra.mrb[0].mxu0 %vm324_vm0, %v7509_v25  ;;  %v9175_v25 = vld [vmem:[#allocation40_spill] sm:$0xff] }
 0x108   : > { %6961 = vmatpush3.bf16.msra.mxu0 %v8143_v31  ;;  %6437 = vmatprep.mubr.msk.f32.mxu1 %vm324_vm0, %v7886_v20  ;;  %v9181_v31 = vld [vmem:[#allocation44_spill] sm:$0xff] }
 0x109   : > { %6781 = vmatprep.mubr.msk.f32.mxu0 %vm324_vm0, %v7520_v26  ;;  %v9176_v26 = vld [vmem:[#allocation3_spill] sm:$0xff]  ;;  %v9197_v14 = vld [vmem:[#allocation60_spill] sm:$0xff] }
 0x10a   : > { %v9202_v20 = vld [vmem:[#allocation16_spill] sm:$0xff] }
 0x10b   : > { %6438 = vmatmul.mubr.msk.f32.gmra.mrb[26].mxu1 %vm324_vm0, %v7890_v10  ;;  %6782 = vmatmul.mubr.msk.f32.gmra.mrb[2].mxu0 %vm324_vm0, %v7523_v27  ;;  %v9177_v27 = vld [vmem:[#allocation41_spill] sm:$0xff]  ;;  %v9194_v10 = vld [vmem:[#allocation12_spill] sm:$0xff] }
 0x10c   : > { %6440 = vmatprep.mubr.msk.f32.mxu1 %vm324_vm0, %v7907_v5  ;;  %6784 = vmatprep.mubr.msk.f32.mxu0 %vm324_vm0, %v7533_v28  ;;  %v9178_v28 = vld [vmem:[#allocation4_spill] sm:$0xff]  ;;  %v9191_v5 = vld [vmem:[#allocation54_spill] sm:$0xff] }
 0x10f   : > { %6441 = vmatmul.mubr.msk.f32.gmra.mrb[28].mxu1 %vm324_vm0, %v7913_v63  ;;  %6785 = vmatmul.mubr.msk.f32.gmra.mrb[4].mxu0 %vm324_vm0, %v7536_v29  ;;  %v9179_v29 = vld [vmem:[#allocation42_spill] sm:$0xff]  ;;  %v9186_v63 = vld [vmem:[#allocation8_spill] sm:$0xff] }
 0x110   : > { %6443 = vmatprep.mubr.msk.f32.mxu1 %vm324_vm0, %v7924_v22  ;;  %6787 = vmatprep.mubr.msk.f32.mxu0 %vm324_vm0, %v7547_v30  ;;  %v9180_v30 = vld [vmem:[#allocation5_spill] sm:$0xff] }
 0x111   : > { %v9204_v22 = vld [vmem:[#allocation17_spill] sm:$0xff] }
 0x113   : > { %6444 = vmatmul.mubr.msk.f32.gmra.mrb[30].mxu1 %vm324_vm0, %v7932_v8  ;;  %6788 = vmatmul.mubr.msk.f32.gmra.mrb[6].mxu0 %vm324_vm0, %v9174_v24  ;;  %v9206_v8 = vld [vmem:[#allocation18_spill] sm:$0xff]  ;;  %v9212_v24 = vld [vmem:[#allocation21_spill] sm:$0xff] }
 0x114   : > { %6446 = vmatprep.mubr.msk.f32.mxu1 %vm324_vm0, %v9175_v25  ;;  %6790 = vmatprep.mubr.msk.f32.mxu0 %vm324_vm0, %v9176_v26  ;;  %v9213_v25 = vld [vmem:[#allocation22_spill] sm:$0xff]  ;;  %v9214_v26 = vld [vmem:[#allocation23_spill] sm:$0xff] }
 0x117   : > { %6447 = vmatmul.mubr.msk.f32.gmra.mrb[32].mxu1 %vm324_vm0, %v9177_v27  ;;  %6791 = vmatmul.mubr.msk.f32.gmra.mrb[8].mxu0 %vm324_vm0, %v9178_v28  ;;  %v9215_v27 = vld [vmem:[#allocation43_spill] sm:$0xff]  ;;  %v9217_v28 = vld [vmem:[#allocation45_spill] sm:$0xff] }
 0x118   : > { %6449 = vmatprep.mubr.msk.f32.mxu1 %vm324_vm0, %v9179_v29  ;;  %6793 = vmatprep.mubr.msk.f32.mxu0 %vm324_vm0, %v9180_v30  ;;  %v9218_v29 = vld [vmem:[#allocation25_spill] sm:$0xff]  ;;  %v9220_v30 = vld [vmem:[#allocation26_spill] sm:$0xff] }
 0x11b   : > { %6450 = vmatmul.mubr.msk.f32.gmra.mrb[34].mxu1 %vm324_vm0, %v9181_v31  ;;  %6794 = vmatmul.mubr.msk.f32.gmra.mrb[10].mxu0 %vm324_vm0, %v9182_v57  ;;  %v9222_v31 = vld [vmem:[#allocation27_spill] sm:$0xff] }
 0x11c   : > { %6452 = vmatprep.mubr.msk.f32.mxu1 %vm324_vm0, %v9183_v58  ;;  %6796 = vmatprep.mubr.msk.f32.mxu0 %vm324_vm0, %v9184_v60  ;;  %v9223_v57 = vld [vmem:[#allocation51_spill] sm:$0xff]  ;;  %v9224_v58 = vld [vmem:[#allocation28_spill] sm:$0xff]  ;;  %v9225_v60 = vld [vmem:[#allocation53_spill] sm:$0xff] }
 0x11f   : > { %6453 = vmatmul.mubr.msk.f32.gmra.mrb[36].mxu1 %vm324_vm0, %v9185_v62  ;;  %6797 = vmatmul.mubr.msk.f32.gmra.mrb[12].mxu0 %vm324_vm0, %v9186_v63  ;;  %v9226_v62 = vld [vmem:[#allocation29_spill] sm:$0xff]  ;;  %v9227_v63 = vld [vmem:[#allocation55_spill] sm:$0xff] }
 0x120   : > { %6455 = vmatprep.mubr.msk.f32.mxu1 %vm324_vm0, %v9187_v0  ;;  %6799 = vmatprep.mubr.msk.f32.mxu0 %vm324_vm0, %v9188_v1  ;;  %v9228_v0 = vld [vmem:[#allocation30_spill] sm:$0xff]  ;;  %v9229_v1 = vld [vmem:[#allocation57_spill] sm:$0xff] }
 0x123   : > { %6456 = vmatmul.mubr.msk.f32.gmra.mrb[38].mxu1 %vm324_vm0, %v9189_v2  ;;  %6800 = vmatmul.mubr.msk.f32.gmra.mrb[14].mxu0 %vm324_vm0, %v9190_v4  ;;  %v9230_v2 = vld [vmem:[#allocation31_spill] sm:$0xff] }
 0x124   : > { %6458 = vmatprep.mubr.msk.f32.mxu1 %vm324_vm0, %v9191_v5  ;;  %6802 = vmatprep.mubr.msk.f32.mxu0 %vm324_vm0, %v9192_v6  ;;  %v9231_v4 = vld [vmem:[#allocation59_spill] sm:$0xff]  ;;  %v9232_v5 = vld [vmem:[#allocation32_spill] sm:$0xff]  ;;  %v9233_v6 = vld [vmem:[#allocation61_spill] sm:$0xff] }
 0x127   : > { %6459 = vmatmul.mubr.msk.f32.gmra.mrb[40].mxu1 %vm324_vm0, %v9193_v9  ;;  %6803 = vmatmul.mubr.msk.f32.gmra.mrb[16].mxu0 %vm324_vm0, %v9194_v10  ;;  %v9234_v9 = vld [vmem:[#allocation33_spill] sm:$0xff]  ;;  %v9235_v10 = vld [vmem:[#allocation63_spill] sm:$0xff] }
 0x128   : > { %6461 = vmatprep.mubr.msk.f32.mxu1 %vm324_vm0, %v9195_v11  ;;  %6805 = vmatprep.mubr.msk.f32.mxu0 %vm324_vm0, %v9196_v13  ;;  %v9236_v11 = vld [vmem:[#allocation34_spill] sm:$0xff]  ;;  %v9237_v13 = vld [vmem:[#allocation65_spill] sm:$0xff] }
 0x12b   : > { %6462 = vmatmul.mubr.msk.f32.gmra.mrb[42].mxu1 %vm324_vm0, %v9197_v14  ;;  %6806 = vmatmul.mubr.msk.f32.gmra.mrb[18].mxu0 %vm324_vm0, %v9198_v15  ;;  %v9238_v14 = vld [vmem:[#allocation35_spill] sm:$0xff] }
 0x12c   : > { %6464 = vmatprep.mubr.msk.f32.mxu1 %vm324_vm0, %v9199_v17  ;;  %6808 = vmatprep.mubr.msk.f32.mxu0 %vm324_vm0, %v9200_v18  ;;  %v8576_v15 = vld [vmem:[%s7487_s25 + $0x181] sm:$0xff]  ;;  %v9240_v18 = vld [vmem:[#allocation36_spill] sm:$0xff] }
 0x12d   : > { %v9239_v17 = vld [vmem:[#allocation67_spill] sm:$0xff] }
 0x12f   : > { %6465 = vmatmul.mubr.msk.f32.gmra.mrb[44].mxu1 %vm324_vm0, %v9201_v19  ;;  %6809 = vmatmul.mubr.msk.f32.gmra.mrb[20].mxu0 %vm324_vm0, %v9202_v20  ;;  %v9241_v19 = vld [vmem:[#allocation69_spill] sm:$0xff]  ;;  %v8587_v20 = vld [vmem:[%s7487_s25 + $0x189] sm:$0xff] }
 0x130   : > { %6467 = vmatprep.mubr.msk.f32.mxu1 %vm324_vm0, %v9203_v21  ;;  %6811 = vmatprep.mubr.msk.f32.mxu0 %vm324_vm0, %v9204_v22  ;;  %v8590_v21 = vld [vmem:[%s7487_s25 + $0x191] sm:$0xff]  ;;  %v9242_v22 = vld [vmem:[#allocation70_spill] sm:$0xff] }
 0x133   : > { %6468 = vmatmul.mubr.msk.f32.gmra.mrb[46].mxu1 %vm324_vm0, %v9205_v46  ;;  %6812 = vmatmul.mubr.msk.f32.gmra.mrb[22].mxu0 %vm324_vm0, %v9206_v8  ;;  %v9243_v46 = vld [vmem:[#allocation71_spill] sm:$0xff]  ;;  %v4008_v8 = vld [vmem:[%s7487_s25 + $0x199] sm:$0xff] }
 0x134   : > { %6474 = vmatprep.mubr.msk.f32.mxu1 %vm324_vm0, %v9207_v3  ;;  %6814 = vmatprep.mubr.msk.f32.mxu0 %vm324_vm0, %v9208_v34  ;;  %v4009_v3 = vld [vmem:[%s7487_s25 + $0x1a1] sm:$0xff]  ;;  %v9244_v34 = vld [vmem:[#allocation72_spill] sm:$0xff] }
 0x137   : > { %6475 = vmatmul.mubr.msk.f32.vlgmr.msra.gmra.mrb[0].mxu1 %vm324_vm0, %v9209_v52  ;;  %6815 = vmatmul.mubr.msk.f32.gmra.mrb[24].mxu0 %vm324_vm0, %v9210_v54  ;;  %v9245_v52 = vld [vmem:[#allocation73_spill] sm:$0xff]  ;;  %v4010_v54 = vld [vmem:[%s7487_s25 + $0x1a9] sm:$0xff] }
 0x138   : > { %6963 = vmatpush3.bf16.msra.mxu1 %v7461_v7  ;;  %6477 = vmatprep.mubr.msk.f32.mxu1 %vm324_vm0, %v9211_v56  ;;  %v9216_v7 = vld [vmem:[#allocation24_spill] sm:$0xff] }
 0x139   : > { %6817 = vmatprep.mubr.msk.f32.mxu0 %vm324_vm0, %v9212_v24  ;;  %v4511_v56 = vld [vmem:[%s7487_s25 + $0x32] sm:$0xff]  ;;  %v9246_v24 = vld [vmem:[#allocation74_spill] sm:$0xff] }
 0x13b   : > { %6478 = vmatmul.mubr.msk.f32.gmra.mrb[2].mxu1 %vm324_vm0, %v7950_v47  ;;  %6818 = vmatmul.mubr.msk.f32.gmra.mrb[26].mxu0 %vm324_vm0, %v9213_v25  ;;  %v9219_v47 = vld [vmem:[#allocation47_spill] sm:$0xff] }
 0x13c   : > { %6480 = vmatprep.mubr.msk.f32.mxu1 %vm324_vm0, %v7964_v59  ;;  %6820 = vmatprep.mubr.msk.f32.mxu0 %vm324_vm0, %v9214_v26  ;;  %v9221_v59 = vld [vmem:[#allocation49_spill] sm:$0xff]  ;;  %v9247_v25 = vld [vmem:[#allocation75_spill] sm:$0xff] }
 0x13d   : > { %v4512_v26 = vld [vmem:[%s7487_s25 + $0x3a] sm:$0xff] }
 0x13f   : > { %6481 = vmatmul.mubr.msk.f32.gmra.mrb[4].mxu1 %vm324_vm0, %v9215_v27  ;;  %6821 = vmatmul.mubr.msk.f32.gmra.mrb[28].mxu0 %vm324_vm0, %v9216_v7  ;;  %v4513_v27 = vld [vmem:[%s7487_s25 + $0x42] sm:$0xff]  ;;  %v4514_v7 = vld [vmem:[%s7487_s25 + $0x4a] sm:$0xff] }
 0x140   : > { %6483 = vmatprep.mubr.msk.f32.mxu1 %vm324_vm0, %v9217_v28  ;;  %6823 = vmatprep.mubr.msk.f32.mxu0 %vm324_vm0, %v9218_v29  ;;  %v4515_v28 = vld [vmem:[%s7487_s25 + $0x52] sm:$0xff]  ;;  %v4517_v29 = vld [vmem:[%s7487_s25 + $0x62] sm:$0xff] }
 0x143   : > { %6484 = vmatmul.mubr.msk.f32.gmra.mrb[6].mxu1 %vm324_vm0, %v9219_v47  ;;  %6824 = vmatmul.mubr.msk.f32.gmra.mrb[30].mxu0 %vm324_vm0, %v9220_v30  ;;  %v2345_v47 = vld [vmem:[%s7487_s25 + $0xe9] sm:$0xff] }
 0x144   : > { %6486 = vmatprep.mubr.msk.f32.mxu1 %vm324_vm0, %v9221_v59  ;;  %6826 = vmatprep.mubr.msk.f32.mxu0 %vm324_vm0, %v9222_v31  ;;  %v4537_v30 = vld [vmem:[%s7487_s25 + $0x102] sm:$0xff]  ;;  %v4538_v59 = vld [vmem:[%s7487_s25 + $0x10a] sm:$0xff]  ;;  %v2347_v31 = vld [vmem:[%s7487_s25 + $0xf9] sm:$0xff] }
 0x147   : > { %6487 = vmatmul.mubr.msk.f32.gmra.mrb[8].mxu1 %vm324_vm0, %v9223_v57  ;;  %6827 = vmatmul.mubr.msk.f32.gmra.mrb[32].mxu0 %vm324_vm0, %v9224_v58  ;;  %v4539_v57 = vld [vmem:[%s7487_s25 + $0x112] sm:$0xff]  ;;  %v2348_v58 = vld [vmem:[%s7487_s25 + $0x101] sm:$0xff] }
 0x148   : > { %6489 = vmatprep.mubr.msk.f32.mxu1 %vm324_vm0, %v9225_v60  ;;  %6829 = vmatprep.mubr.msk.f32.mxu0 %vm324_vm0, %v9226_v62  ;;  %v4540_v60 = vld [vmem:[%s7487_s25 + $0x11a] sm:$0xff]  ;;  %v2349_v62 = vld [vmem:[%s7487_s25 + $0x109] sm:$0xff] }
 0x14b   : > { %6490 = vmatmul.mubr.msk.f32.gmra.mrb[10].mxu1 %vm324_vm0, %v9227_v63  ;;  %6830 = vmatmul.mubr.msk.f32.gmra.mrb[34].mxu0 %vm324_vm0, %v9228_v0  ;;  %v4541_v63 = vld [vmem:[%s7487_s25 + $0x122] sm:$0xff]  ;;  %v2350_v0 = vld [vmem:[%s7487_s25 + $0x111] sm:$0xff] }
 0x14c   : > { %6492 = vmatprep.mubr.msk.f32.mxu1 %vm324_vm0, %v9229_v1  ;;  %6832 = vmatprep.mubr.msk.f32.mxu0 %vm324_vm0, %v9230_v2  ;;  %v4542_v1 = vld [vmem:[%s7487_s25 + $0x12a] sm:$0xff]  ;;  %v2351_v2 = vld [vmem:[%s7487_s25 + $0x119] sm:$0xff] }
 0x14f   : > { %6493 = vmatmul.mubr.msk.f32.gmra.mrb[12].mxu1 %vm324_vm0, %v9231_v4  ;;  %6833 = vmatmul.mubr.msk.f32.gmra.mrb[36].mxu0 %vm324_vm0, %v9232_v5  ;;  %v4543_v4 = vld [vmem:[%s7487_s25 + $0x132] sm:$0xff]  ;;  %v2352_v5 = vld [vmem:[%s7487_s25 + $0x121] sm:$0xff] }
 0x150   : > { %6495 = vmatprep.mubr.msk.f32.mxu1 %vm324_vm0, %v9233_v6  ;;  %6835 = vmatprep.mubr.msk.f32.mxu0 %vm324_vm0, %v9234_v9  ;;  %v4544_v6 = vld [vmem:[%s7487_s25 + $0x13a] sm:$0xff]  ;;  %v2353_v9 = vld [vmem:[%s7487_s25 + $0x129] sm:$0xff] }
 0x153   : > { %6496 = vmatmul.mubr.msk.f32.gmra.mrb[14].mxu1 %vm324_vm0, %v9235_v10  ;;  %6836 = vmatmul.mubr.msk.f32.gmra.mrb[38].mxu0 %vm324_vm0, %v9236_v11  ;;  %v4545_v10 = vld [vmem:[%s7487_s25 + $0x142] sm:$0xff]  ;;  %v2354_v11 = vld [vmem:[%s7487_s25 + $0x131] sm:$0xff] }
 0x154   : > { %6498 = vmatprep.mubr.msk.f32.mxu1 %vm324_vm0, %v9237_v13  ;;  %6838 = vmatprep.mubr.msk.f32.mxu0 %vm324_vm0, %v9238_v14  ;;  %v4546_v13 = vld [vmem:[%s7487_s25 + $0x14a] sm:$0xff]  ;;  %v2355_v14 = vld [vmem:[%s7487_s25 + $0x139] sm:$0xff] }
 0x157   : > { %6499 = vmatmul.mubr.msk.f32.gmra.mrb[16].mxu1 %vm324_vm0, %v9239_v17  ;;  %6839 = vmatmul.mubr.msk.f32.gmra.mrb[40].mxu0 %vm324_vm0, %v9240_v18  ;;  %v4547_v17 = vld [vmem:[%s7487_s25 + $0x152] sm:$0xff]  ;;  %v2356_v18 = vld [vmem:[%s7487_s25 + $0x141] sm:$0xff] }
 0x158   : > { %6501 = vmatprep.mubr.msk.f32.mxu1 %vm324_vm0, %v9241_v19  ;;  %6841 = vmatprep.mubr.msk.f32.mxu0 %vm324_vm0, %v8576_v15  ;;  %v4548_v19 = vld [vmem:[%s7487_s25 + $0x15a] sm:$0xff] }
 0x15b   : > { %6502 = vmatmul.mubr.msk.f32.gmra.mrb[18].mxu1 %vm324_vm0, %v9242_v22  ;;  %6842 = vmatmul.mubr.msk.f32.gmra.mrb[42].mxu0 %vm324_vm0, %v8587_v20  ;;  %v2357_v22 = vld [vmem:[%s7487_s25 + $0x149] sm:$0xff] }
 0x15c   : > { %6504 = vmatprep.mubr.msk.f32.mxu1 %vm324_vm0, %v9243_v46  ;;  %6844 = vmatprep.mubr.msk.f32.mxu0 %vm324_vm0, %v8590_v21  ;;  %v4549_v46 = vld [vmem:[%s7487_s25 + $0x162] sm:$0xff] }
 0x15f   : > { %6505 = vmatmul.mubr.msk.f32.gmra.mrb[20].mxu1 %vm324_vm0, %v9244_v34  ;;  %6845 = vmatmul.mubr.msk.f32.gmra.mrb[44].mxu0 %vm324_vm0, %v4008_v8  ;;  %v2358_v8 = vld [vmem:[%s7487_s25 + $0x151] sm:$0xff]  ;;  %v2359_v34 = vld [vmem:[%s7487_s25 + $0x159] sm:$0xff] }
 0x160   : > { %6507 = vmatprep.mubr.msk.f32.mxu1 %vm324_vm0, %v9245_v52  ;;  %6847 = vmatprep.mubr.msk.f32.mxu0 %vm324_vm0, %v4009_v3  ;;  %v4550_v3 = vld [vmem:[%s7487_s25 + $0x16a] sm:$0xff]  ;;  %v4551_v52 = vld [vmem:[%s7487_s25 + $0x172] sm:$0xff] }
 0x163   : > { %6508 = vmatmul.mubr.msk.f32.gmra.mrb[22].mxu1 %vm324_vm0, %v9246_v24  ;;  %6848 = vmatmul.mubr.msk.f32.gmra.mrb[46].mxu0 %vm324_vm0, %v4010_v54  ;;  %v2360_v54 = vld [vmem:[%s7487_s25 + $0x161] sm:$0xff]  ;;  %v2361_v24 = vld [vmem:[%s7487_s25 + $0x169] sm:$0xff] }
 0x164   : > { %6510 = vmatprep.mubr.msk.f32.mxu1 %vm324_vm0, %v9247_v25  ;;  %6854 = vmatprep.mubr.msk.f32.mxu0 %vm324_vm0, %v4511_v56  ;;  %v4552_v56 = vld [vmem:[%s7487_s25 + $0x17a] sm:$0xff]  ;;  %v4553_v25 = vld [vmem:[%s7487_s25 + $0x182] sm:$0xff] }
 0x167   : > { %6511 = vmatmul.mubr.msk.f32.gmra.mrb[24].mxu1 %vm324_vm0, %v8158_v32  ;;  %6855 = vmatmul.mubr.msk.f32.vlgmr.msra.gmra.mrb[0].mxu0 %vm324_vm0, %v4512_v26  ;;  %v4516_v32 = vld [vmem:[%s7487_s25 + $0x5a] sm:$0xff]  ;;  %v2362_v26 = vld [vmem:[%s7487_s25 + $0x171] sm:$0xff] }
 0x168   : > { %6513 = vmatprep.mubr.msk.f32.mxu1 %vm324_vm0, %v8170_v49  ;;  %6857 = vmatprep.mubr.msk.f32.mxu0 %vm324_vm0, %v4513_v27  ;;  %v4518_v49 = vld [vmem:[%s7487_s25 + $0x6a] sm:$0xff] }
 0x169   : > { %v4554_v27 = vld [vmem:[%s7487_s25 + $0x18a] sm:$0xff] }
 0x16b   : > { %6514 = vmatmul.mubr.msk.f32.gmra.mrb[26].mxu1 %vm324_vm0, %v8173_v39  ;;  %6858 = vmatmul.mubr.msk.f32.gmra.mrb[2].mxu0 %vm324_vm0, %v4514_v7  ;;  %v4519_v39 = vld [vmem:[%s7487_s25 + $0x72] sm:$0xff] }
 0x16c   : > { %6516 = vmatprep.mubr.msk.f32.mxu1 %vm324_vm0, %v8184_v23  ;;  %6860 = vmatprep.mubr.msk.f32.mxu0 %vm324_vm0, %v4515_v28  ;;  %v4521_v23 = vld [vmem:[%s7487_s25 + $0x82] sm:$0xff]  ;;  %v2363_v7 = vld [vmem:[%s7487_s25 + $0x179] sm:$0xff] }
 0x16d   : > { %v4555_v28 = vld [vmem:[%s7487_s25 + $0x192] sm:$0xff] }
 0x16f   : > { %6517 = vmatmul.mubr.msk.f32.gmra.mrb[28].mxu1 %vm324_vm0, %v8187_v53  ;;  %6861 = vmatmul.mubr.msk.f32.gmra.mrb[4].mxu0 %vm324_vm0, %v4516_v32  ;;  %v4520_v53 = vld [vmem:[%s7487_s25 + $0x7a] sm:$0xff] }
 0x170   : > { %6519 = vmatprep.mubr.msk.f32.mxu1 %vm324_vm0, %v8198_v44  ;;  %6863 = vmatprep.mubr.msk.f32.mxu0 %vm324_vm0, %v4517_v29  ;;  %v4523_v44 = vld [vmem:[%s7487_s25 + $0x92] sm:$0xff]  ;;  %v4556_v32 = vld [vmem:[%s7487_s25 + $0x19a] sm:$0xff]  ;;  %v4557_v29 = vld [vmem:[%s7487_s25 + $0x1a2] sm:$0xff] }
 0x173   : > { %6520 = vmatmul.mubr.msk.f32.gmra.mrb[30].mxu1 %vm324_vm0, %v8201_v42  ;;  %6864 = vmatmul.mubr.msk.f32.gmra.mrb[6].mxu0 %vm324_vm0, %v4518_v49  ;;  %v4522_v42 = vld [vmem:[%s7487_s25 + $0x8a] sm:$0xff] }
 0x174   : > { %6522 = vmatprep.mubr.msk.f32.mxu1 %vm324_vm0, %v8212_v40  ;;  %6866 = vmatprep.mubr.msk.f32.mxu0 %vm324_vm0, %v4519_v39  ;;  %v4525_v40 = vld [vmem:[%s7487_s25 + $0xa2] sm:$0xff]  ;;  %v4558_v49 = vld [vmem:[%s7487_s25 + $0x1aa] sm:$0xff] }
 0x177   : > { %6523 = vmatmul.mubr.msk.f32.gmra.mrb[32].mxu1 %vm324_vm0, %v8215_v38  ;;  %6867 = vmatmul.mubr.msk.f32.gmra.mrb[8].mxu0 %vm324_vm0, %v4520_v53  ;;  %v4524_v38 = vld [vmem:[%s7487_s25 + $0x9a] sm:$0xff] }
 0x178   : > { %6525 = vmatprep.mubr.msk.f32.mxu1 %vm324_vm0, %v8226_v41  ;;  %6869 = vmatprep.mubr.msk.f32.mxu0 %vm324_vm0, %v4521_v23  ;;  %v4526_v41 = vld [vmem:[%s7487_s25 + $0xaa] sm:$0xff] }
 0x17b   : > { %6526 = vmatmul.mubr.msk.f32.gmra.mrb[34].mxu1 %vm324_vm0, %v8229_v51  ;;  %6870 = vmatmul.mubr.msk.f32.gmra.mrb[10].mxu0 %vm324_vm0, %v4522_v42  ;;  %v4527_v51 = vld [vmem:[%s7487_s25 + $0xb2] sm:$0xff] }
 0x17c   : > { %6528 = vmatprep.mubr.msk.f32.mxu1 %vm324_vm0, %v8240_v37  ;;  %6872 = vmatprep.mubr.msk.f32.mxu0 %vm324_vm0, %v4523_v44  ;;  %v4528_v37 = vld [vmem:[%s7487_s25 + $0xba] sm:$0xff] }
 0x17f   : > { %6529 = vmatmul.mubr.msk.f32.gmra.mrb[36].mxu1 %vm324_vm0, %v8243_v55  ;;  %6873 = vmatmul.mubr.msk.f32.gmra.mrb[12].mxu0 %vm324_vm0, %v4524_v38  ;;  %v4529_v55 = vld [vmem:[%s7487_s25 + $0xc2] sm:$0xff] }
 0x180   : > { %6531 = vmatprep.mubr.msk.f32.mxu1 %vm324_vm0, %v8254_v36  ;;  %6875 = vmatprep.mubr.msk.f32.mxu0 %vm324_vm0, %v4525_v40  ;;  %v4530_v36 = vld [vmem:[%s7487_s25 + $0xca] sm:$0xff] }
 0x183   : > { %6532 = vmatmul.mubr.msk.f32.gmra.mrb[38].mxu1 %vm324_vm0, %v8257_v12  ;;  %6876 = vmatmul.mubr.msk.f32.gmra.mrb[14].mxu0 %vm324_vm0, %v4526_v41  ;;  %v4531_v12 = vld [vmem:[%s7487_s25 + $0xd2] sm:$0xff] }
 0x184   : > { %6534 = vmatprep.mubr.msk.f32.mxu1 %vm324_vm0, %v8268_v35  ;;  %6878 = vmatprep.mubr.msk.f32.mxu0 %vm324_vm0, %v4527_v51  ;;  %v4532_v35 = vld [vmem:[%s7487_s25 + $0xda] sm:$0xff] }
 0x187   : > { %6535 = vmatmul.mubr.msk.f32.gmra.mrb[40].mxu1 %vm324_vm0, %v8271_v16  ;;  %6879 = vmatmul.mubr.msk.f32.gmra.mrb[16].mxu0 %vm324_vm0, %v4528_v37  ;;  %v2343_v16 = vld [vmem:[%s7487_s25 + $0xd9] sm:$0xff] }
 0x188   : > { %6537 = vmatprep.mubr.msk.f32.mxu1 %vm324_vm0, %v8282_v43  ;;  %6881 = vmatprep.mubr.msk.f32.mxu0 %vm324_vm0, %v4529_v55  ;;  %v4533_v43 = vld [vmem:[%s7487_s25 + $0xe2] sm:$0xff] }
 0x18b   : > { %6538 = vmatmul.mubr.msk.f32.gmra.mrb[42].mxu1 %vm324_vm0, %v8285_v61  ;;  %6882 = vmatmul.mubr.msk.f32.gmra.mrb[18].mxu0 %vm324_vm0, %v4530_v36  ;;  %v4534_v61 = vld [vmem:[%s7487_s25 + $0xea] sm:$0xff] }
 0x18c   : > { %6540 = vmatprep.mubr.msk.f32.mxu1 %vm324_vm0, %v8296_v33  ;;  %6884 = vmatprep.mubr.msk.f32.mxu0 %vm324_vm0, %v4531_v12  ;;  %v4535_v33 = vld [vmem:[%s7487_s25 + $0xf2] sm:$0xff] }
 0x18f   : > { %6541 = vmatmul.mubr.msk.f32.gmra.mrb[44].mxu1 %vm324_vm0, %v8373_v45  ;;  %6885 = vmatmul.mubr.msk.f32.gmra.mrb[20].mxu0 %vm324_vm0, %v4532_v35  ;;  %v2344_v45 = vld [vmem:[%s7487_s25 + $0xe1] sm:$0xff] }
 0x190   : > { %6543 = vmatprep.mubr.msk.f32.mxu1 %vm324_vm0, %v8384_v48  ;;  %6887 = vmatprep.mubr.msk.f32.mxu0 %vm324_vm0, %v4533_v43  ;;  %v4536_v48 = vld [vmem:[%s7487_s25 + $0xfa] sm:$0xff] }
 0x193   : > { %6544 = vmatmul.mubr.msk.f32.gmra.mrb[46].mxu1 %vm324_vm0, %v8387_v50  ;;  %6888 = vmatmul.mubr.msk.f32.gmra.mrb[22].mxu0 %vm324_vm0, %v4534_v61  ;;  %v2346_v50 = vld [vmem:[%s7487_s25 + $0xf1] sm:$0xff] }
 0x194   : > { %6586 = vmatprep.mubr.msk.f32.mxu1 %vm324_vm0, %v2343_v16  ;;  %6890 = vmatprep.mubr.msk.f32.mxu0 %vm324_vm0, %v4535_v33 }
 0x197   : > { %6587 = vmatmul.mubr.msk.f32.vlgmr.msra.gmra.mrb[24].mxu1 %vm324_vm0, %v2344_v45  ;;  %6891 = vmatmul.mubr.msk.f32.gmra.mrb[24].mxu0 %vm324_vm0, %v4536_v48 }
 0x198   : > { %6589 = vmatprep.mubr.msk.f32.mxu1 %vm324_vm0, %v2345_v47  ;;  %6893 = vmatprep.mubr.msk.f32.mxu0 %vm324_vm0, %v4537_v30 }
 0x19b   : > { %6590 = vmatmul.mubr.msk.f32.gmra.mrb[26].mxu1 %vm324_vm0, %v2346_v50  ;;  %6894 = vmatmul.mubr.msk.f32.gmra.mrb[26].mxu0 %vm324_vm0, %v4538_v59  ;;  %v8840_v50 = vld [vmem:[%s9023_s2] ss:$0 sm:$0xff] }
 0x19c   : > { %6592 = vmatprep.mubr.msk.f32.mxu1 %vm324_vm0, %v2347_v31  ;;  %6896 = vmatprep.mubr.msk.f32.mxu0 %vm324_vm0, %v4539_v57  ;;  %v8845_v57 = vld [vmem:[%s9024_s3] ss:$0 sm:$0xff] }
 0x19f   : > { %6593 = vmatmul.mubr.msk.f32.gmra.mrb[28].mxu1 %vm324_vm0, %v2348_v58  ;;  %6897 = vmatmul.mubr.msk.f32.gmra.mrb[28].mxu0 %vm324_vm0, %v4540_v60 }
 0x1a0   : > { %6595 = vmatprep.mubr.msk.f32.mxu1 %vm324_vm0, %v2349_v62  ;;  %6899 = vmatprep.mubr.msk.f32.mxu0 %vm324_vm0, %v4541_v63 }
 0x1a3   : > { %6596 = vmatmul.mubr.msk.f32.gmra.mrb[30].mxu1 %vm324_vm0, %v2350_v0  ;;  %6900 = vmatmul.mubr.msk.f32.gmra.mrb[30].mxu0 %vm324_vm0, %v4542_v1 }
 0x1a4   : > { %6598 = vmatprep.mubr.msk.f32.mxu1 %vm324_vm0, %v2351_v2  ;;  %6902 = vmatprep.mubr.msk.f32.mxu0 %vm324_vm0, %v4543_v4 }
 0x1a7   : > { %6599 = vmatmul.mubr.msk.f32.gmra.mrb[32].mxu1 %vm324_vm0, %v2352_v5  ;;  %6903 = vmatmul.mubr.msk.f32.gmra.mrb[32].mxu0 %vm324_vm0, %v4544_v6 }
 0x1a8   : > { %6601 = vmatprep.mubr.msk.f32.mxu1 %vm324_vm0, %v2353_v9  ;;  %6905 = vmatprep.mubr.msk.f32.mxu0 %vm324_vm0, %v4545_v10 }
 0x1ab   : > { %6602 = vmatmul.mubr.msk.f32.gmra.mrb[34].mxu1 %vm324_vm0, %v2354_v11  ;;  %6906 = vmatmul.mubr.msk.f32.gmra.mrb[34].mxu0 %vm324_vm0, %v4546_v13 }
 0x1ac   : > { %6604 = vmatprep.mubr.msk.f32.mxu1 %vm324_vm0, %v2355_v14  ;;  %6908 = vmatprep.mubr.msk.f32.mxu0 %vm324_vm0, %v4547_v17 }
 0x1af   : > { %6605 = vmatmul.mubr.msk.f32.gmra.mrb[36].mxu1 %vm324_vm0, %v2356_v18  ;;  %6909 = vmatmul.mubr.msk.f32.gmra.mrb[36].mxu0 %vm324_vm0, %v4548_v19 }
 0x1b0   : > { %6607 = vmatprep.mubr.msk.f32.mxu1 %vm324_vm0, %v2357_v22  ;;  %6911 = vmatprep.mubr.msk.f32.mxu0 %vm324_vm0, %v4549_v46 }
 0x1b3   : > { %6608 = vmatmul.mubr.msk.f32.gmra.mrb[38].mxu1 %vm324_vm0, %v2358_v8  ;;  %6912 = vmatmul.mubr.msk.f32.gmra.mrb[38].mxu0 %vm324_vm0, %v4550_v3 }
 0x1b4   : > { %6610 = vmatprep.mubr.msk.f32.mxu1 %vm324_vm0, %v2359_v34  ;;  %6914 = vmatprep.mubr.msk.f32.mxu0 %vm324_vm0, %v4551_v52 }
 0x1b7   : > { %6611 = vmatmul.mubr.msk.f32.gmra.mrb[40].mxu1 %vm324_vm0, %v2360_v54  ;;  %6915 = vmatmul.mubr.msk.f32.gmra.mrb[40].mxu0 %vm324_vm0, %v4552_v56 }
 0x1b8   : > { %6613 = vmatprep.mubr.msk.f32.mxu1 %vm324_vm0, %v2361_v24  ;;  %6917 = vmatprep.mubr.msk.f32.mxu0 %vm324_vm0, %v4553_v25 }
 0x1bb   : > { %6614 = vmatmul.mubr.msk.f32.gmra.mrb[42].mxu1 %vm324_vm0, %v2362_v26  ;;  %6918 = vmatmul.mubr.msk.f32.gmra.mrb[42].mxu0 %vm324_vm0, %v4554_v27 }
 0x1bc   : > { %6616 = vmatprep.mubr.msk.f32.mxu1 %vm324_vm0, %v2363_v7  ;;  %6920 = vmatprep.mubr.msk.f32.mxu0 %vm324_vm0, %v4555_v28 }
 0x1bf   : > { %6617 = vmatmul.mubr.msk.f32.gmra.mrb[44].mxu1 %vm324_vm0, %v8576_v15  ;;  %6921 = vmatmul.mubr.msk.f32.gmra.mrb[44].mxu0 %vm324_vm0, %v4556_v32 }
 0x1c0   : > { %6619 = vmatprep.mubr.msk.f32.mxu1 %vm324_vm0, %v8587_v20  ;;  %6923 = vmatprep.mubr.msk.f32.mxu0 %vm324_vm0, %v4557_v29 }
 0x1c3   : > { %6620 = vmatmul.mubr.msk.f32.gmra.mrb[46].mxu1 %vm324_vm0, %v8590_v21  ;;  %6924 = vmatmul.mubr.msk.f32.gmra.mrb[46].mxu0 %vm324_vm0, %v4558_v49 }
 0x20a   : > { %v6476_v39 = vpop.f32.mrb[0].mxu1 }
 0x20b   : > { %v2032_v53 = vpop.f32.mrb[1].mxu1 }
 0x20e   : > { %v6479_v23 = vpop.f32.mrb[2].mxu1 }
 0x20f   : > { %v2042_v42 = vpop.f32.mrb[3].mxu1 }
 0x212   : > { %v6482_v44 = vpop.f32.mrb[4].mxu1 }
 0x213   : > { %v2052_v15 = vpop.f32.mrb[5].mxu1 }
 0x216   : > { %v6485_v38 = vpop.f32.mrb[6].mxu1 }
 0x217   : > { %v2062_v40 = vpop.f32.mrb[7].mxu1 }
 0x21a   : > { %v8804_v41 = vpop.f32.mrb[8].mxu1 }
 0x21b   : > { %v8806_v20 = vpop.f32.mrb[9].mxu1 }
 0x21e   : > { %v8808_v51 = vpop.f32.mrb[10].mxu1 }
 0x21f   : > { %v8810_v37 = vpop.f32.mrb[11].mxu1 }
 0x222   : > { %v8812_v21 = vpop.f32.mrb[12].mxu1 }
 0x223   : > { %v8814_v55 = vpop.f32.mrb[13].mxu1 }
 0x226   : > { %v8816_v36 = vpop.f32.mrb[14].mxu1 }
 0x227   : > { %v8818_v12 = vpop.f32.mrb[15].mxu1 }
 0x22a   : > { %v8820_v35 = vpop.f32.mrb[16].mxu1 }
 0x22b   : > { %v8822_v43 = vpop.f32.mrb[17].mxu1 }
 0x22e   : > { %v8824_v61 = vpop.f32.mrb[18].mxu1 }
 0x22f   : > { %v8826_v16 = vpop.f32.mrb[19].mxu1 }
 0x232   : > { %v8829_v33 = vpop.f32.mrb[20].mxu1 }
 0x233   : > { %v8831_v45 = vpop.f32.mrb[21].mxu1 }
 0x236   : > { %v8833_v48 = vpop.f32.mrb[22].mxu1 }
 0x237   : > { %v8835_v47 = vpop.f32.mrb[23].mxu1 }
 0x23a   : > { %v6856_v30 = vpop.f32.mrb[0].mxu0 }
 0x23b   : > { %v6964_v59 = vadd.f32 %v6856_v30, %v6476_v39  ;;  %v4772_v31 = vpop.f32.mrb[1].mxu0 }
 0x23c   : > { %v6965_v58 = vadd.f32 %v4772_v31, %v2032_v53 }
 0x23d   : > { %v5067_v60 = vmul.f32 %v6964_v59, %v8840_v50 }
 0x23e   : > { %v5066_v62 = vmul.f32 %v6965_v58, %v8840_v50  ;;  %v6859_v63 = vpop.f32.mrb[2].mxu0 }
 0x23f   : > { %v5122_v0 = vadd.f32 %v8845_v57, %v5067_v60  ;;  %v6966_v1 = vadd.f32 %v6859_v63, %v6479_v23  ;;  %v4782_v2 = vpop.f32.mrb[3].mxu0 }
 0x240   : > { %v5121_v4 = vadd.f32 %v8845_v57, %v5066_v62  ;;  %v6967_v5 = vadd.f32 %v4782_v2, %v2042_v42 }
 0x241   : > { %v5170_v6 = vmax.f32 %v5122_v0, 0.0  ;;  %v5069_v9 = vmul.f32 %v6966_v1, %v8840_v50 }
 0x242   : > { %v5169_v10 = vmax.f32 %v5121_v4, 0.0  ;;  %v5068_v11 = vmul.f32 %v6967_v5, %v8840_v50  ;;  %v6862_v13 = vpop.f32.mrb[4].mxu0 }
 0x243   : > { %5218 = vst [vmem:[%s8853_s23 + $0x8] sm:$0xff] %v5170_v6  ;;  %v5124_v14 = vadd.f32 %v8845_v57, %v5069_v9  ;;  %v6968_v17 = vadd.f32 %v6862_v13, %v6482_v44  ;;  %v4792_v18 = vpop.f32.mrb[5].mxu0 }
 0x244   : > { %5217 = vst [vmem:[%s8853_s23] sm:$0xff] %v5169_v10  ;;  %v5123_v19 = vadd.f32 %v8845_v57, %v5068_v11  ;;  %v6969_v22 = vadd.f32 %v4792_v18, %v2052_v15 }
 0x245   : > { %v5172_v46 = vmax.f32 %v5124_v14, 0.0  ;;  %v5071_v8 = vmul.f32 %v6968_v17, %v8840_v50 }
 0x246   : > { %v5171_v3 = vmax.f32 %v5123_v19, 0.0  ;;  %v5070_v34 = vmul.f32 %v6969_v22, %v8840_v50  ;;  %v6865_v52 = vpop.f32.mrb[6].mxu0 }
 0x247   : > { %5220 = vst [vmem:[%s8853_s23 + $0x18] sm:$0xff] %v5172_v46  ;;  %v5126_v54 = vadd.f32 %v8845_v57, %v5071_v8  ;;  %v6970_v56 = vadd.f32 %v6865_v52, %v6485_v38  ;;  %v4802_v24 = vpop.f32.mrb[7].mxu0 }
 0x248   : > { %5219 = vst [vmem:[%s8853_s23 + $0x10] sm:$0xff] %v5171_v3  ;;  %v5125_v25 = vadd.f32 %v8845_v57, %v5070_v34  ;;  %v6971_v26 = vadd.f32 %v4802_v24, %v2062_v40 }
 0x249   : > { %v5174_v27 = vmax.f32 %v5126_v54, 0.0  ;;  %v5073_v7 = vmul.f32 %v6970_v56, %v8840_v50 }
 0x24a   : > { %v5173_v28 = vmax.f32 %v5125_v25, 0.0  ;;  %v5072_v32 = vmul.f32 %v6971_v26, %v8840_v50  ;;  %v6868_v29 = vpop.f32.mrb[8].mxu0 }
 0x24b   : > { %5222 = vst [vmem:[%s8853_s23 + $0x28] sm:$0xff] %v5174_v27  ;;  %v5128_v49 = vadd.f32 %v8845_v57, %v5073_v7  ;;  %v6972_v39 = vadd.f32 %v6868_v29, %v8804_v41  ;;  %v4812_v53 = vpop.f32.mrb[9].mxu0 }
 0x24c   : > { %5221 = vst [vmem:[%s8853_s23 + $0x20] sm:$0xff] %v5173_v28  ;;  %v5127_v23 = vadd.f32 %v8845_v57, %v5072_v32  ;;  %v6973_v42 = vadd.f32 %v4812_v53, %v8806_v20 }
 0x24d   : > { %v5176_v44 = vmax.f32 %v5128_v49, 0.0  ;;  %v5075_v15 = vmul.f32 %v6972_v39, %v8840_v50 }
 0x24e   : > { %v5175_v38 = vmax.f32 %v5127_v23, 0.0  ;;  %v5074_v40 = vmul.f32 %v6973_v42, %v8840_v50  ;;  %v6871_v30 = vpop.f32.mrb[10].mxu0 }
 0x24f   : > { %5224 = vst [vmem:[%s8853_s23 + $0x38] sm:$0xff] %v5176_v44  ;;  %v5130_v59 = vadd.f32 %v8845_v57, %v5075_v15  ;;  %v6974_v41 = vadd.f32 %v6871_v30, %v8808_v51  ;;  %v4822_v31 = vpop.f32.mrb[11].mxu0 }
 0x250   : > { %5223 = vst [vmem:[%s8853_s23 + $0x30] sm:$0xff] %v5175_v38  ;;  %v5129_v58 = vadd.f32 %v8845_v57, %v5074_v40  ;;  %v6975_v20 = vadd.f32 %v4822_v31, %v8810_v37 }
 0x251   : > { %v5178_v60 = vmax.f32 %v5130_v59, 0.0  ;;  %v5077_v62 = vmul.f32 %v6974_v41, %v8840_v50 }
 0x252   : > { %v5177_v63 = vmax.f32 %v5129_v58, 0.0  ;;  %v5076_v0 = vmul.f32 %v6975_v20, %v8840_v50  ;;  %v6874_v1 = vpop.f32.mrb[12].mxu0 }
 0x253   : > { %5226 = vst [vmem:[%s8853_s23 + $0x48] sm:$0xff] %v5178_v60  ;;  %v5132_v2 = vadd.f32 %v8845_v57, %v5077_v62  ;;  %v6976_v51 = vadd.f32 %v6874_v1, %v8812_v21  ;;  %v4832_v4 = vpop.f32.mrb[13].mxu0 }
 0x254   : > { %5225 = vst [vmem:[%s8853_s23 + $0x40] sm:$0xff] %v5177_v63  ;;  %v5131_v5 = vadd.f32 %v8845_v57, %v5076_v0  ;;  %v6977_v37 = vadd.f32 %v4832_v4, %v8814_v55 }
 0x255   : > { %v5180_v6 = vmax.f32 %v5132_v2, 0.0  ;;  %v5079_v9 = vmul.f32 %v6976_v51, %v8840_v50 }
 0x256   : > { %v5179_v10 = vmax.f32 %v5131_v5, 0.0  ;;  %v5078_v11 = vmul.f32 %v6977_v37, %v8840_v50  ;;  %v6877_v13 = vpop.f32.mrb[14].mxu0 }
 0x257   : > { %5228 = vst [vmem:[%s8853_s23 + $0x58] sm:$0xff] %v5180_v6  ;;  %v5134_v14 = vadd.f32 %v8845_v57, %v5079_v9  ;;  %v6978_v21 = vadd.f32 %v6877_v13, %v8816_v36  ;;  %v4842_v17 = vpop.f32.mrb[15].mxu0 }
 0x258   : > { %5227 = vst [vmem:[%s8853_s23 + $0x50] sm:$0xff] %v5179_v10  ;;  %v5133_v18 = vadd.f32 %v8845_v57, %v5078_v11  ;;  %v6979_v55 = vadd.f32 %v4842_v17, %v8818_v12 }
 0x259   : > { %v5182_v19 = vmax.f32 %v5134_v14, 0.0  ;;  %v5081_v22 = vmul.f32 %v6978_v21, %v8840_v50 }
 0x25a   : > { %v5181_v46 = vmax.f32 %v5133_v18, 0.0  ;;  %v5080_v8 = vmul.f32 %v6979_v55, %v8840_v50  ;;  %v6880_v3 = vpop.f32.mrb[16].mxu0 }
 0x25b   : > { %5230 = vst [vmem:[%s8853_s23 + $0x68] sm:$0xff] %v5182_v19  ;;  %v5136_v34 = vadd.f32 %v8845_v57, %v5081_v22  ;;  %v6980_v36 = vadd.f32 %v6880_v3, %v8820_v35  ;;  %v4852_v52 = vpop.f32.mrb[17].mxu0 }
 0x25c   : > { %5229 = vst [vmem:[%s8853_s23 + $0x60] sm:$0xff] %v5181_v46  ;;  %v5135_v54 = vadd.f32 %v8845_v57, %v5080_v8  ;;  %v6981_v12 = vadd.f32 %v4852_v52, %v8822_v43 }
 0x25d   : > { %v5184_v56 = vmax.f32 %v5136_v34, 0.0  ;;  %v5083_v24 = vmul.f32 %v6980_v36, %v8840_v50 }
 0x25e   : > { %v5183_v25 = vmax.f32 %v5135_v54, 0.0  ;;  %v5082_v26 = vmul.f32 %v6981_v12, %v8840_v50  ;;  %v6883_v27 = vpop.f32.mrb[18].mxu0 }
 0x25f   : > { %5232 = vst [vmem:[%s8853_s23 + $0x78] sm:$0xff] %v5184_v56  ;;  %v5138_v7 = vadd.f32 %v8845_v57, %v5083_v24  ;;  %v6982_v35 = vadd.f32 %v6883_v27, %v8824_v61  ;;  %v4862_v28 = vpop.f32.mrb[19].mxu0 }
 0x260   : > { %5231 = vst [vmem:[%s8853_s23 + $0x70] sm:$0xff] %v5183_v25  ;;  %v5137_v32 = vadd.f32 %v8845_v57, %v5082_v26  ;;  %v6983_v43 = vadd.f32 %v4862_v28, %v8826_v16 }
 0x261   : > { %v5186_v29 = vmax.f32 %v5138_v7, 0.0  ;;  %v5085_v49 = vmul.f32 %v6982_v35, %v8840_v50 }
 0x262   : > { %v5185_v39 = vmax.f32 %v5137_v32, 0.0  ;;  %v5084_v53 = vmul.f32 %v6983_v43, %v8840_v50  ;;  %v6886_v23 = vpop.f32.mrb[20].mxu0 }
 0x263   : > { %5234 = vst [vmem:[%s8853_s23 + $0x88] sm:$0xff] %v5186_v29  ;;  %v5140_v42 = vadd.f32 %v8845_v57, %v5085_v49  ;;  %v6984_v61 = vadd.f32 %v6886_v23, %v8829_v33  ;;  %v4872_v44 = vpop.f32.mrb[21].mxu0 }
 0x264   : > { %5233 = vst [vmem:[%s8853_s23 + $0x80] sm:$0xff] %v5185_v39  ;;  %v5139_v15 = vadd.f32 %v8845_v57, %v5084_v53  ;;  %v6985_v16 = vadd.f32 %v4872_v44, %v8831_v45 }
 0x265   : > { %v5188_v38 = vmax.f32 %v5140_v42, 0.0  ;;  %v5087_v40 = vmul.f32 %v6984_v61, %v8840_v50 }
 0x266   : > { %v5187_v30 = vmax.f32 %v5139_v15, 0.0  ;;  %v5086_v59 = vmul.f32 %v6985_v16, %v8840_v50  ;;  %v6889_v41 = vpop.f32.mrb[22].mxu0 }
 0x267   : > { %5236 = vst [vmem:[%s8853_s23 + $0x98] sm:$0xff] %v5188_v38  ;;  %v5142_v31 = vadd.f32 %v8845_v57, %v5087_v40  ;;  %v6986_v58 = vadd.f32 %v6889_v41, %v8833_v48  ;;  %v4882_v33 = vpop.f32.mrb[23].mxu0 }
 0x268   : > { %5235 = vst [vmem:[%s8853_s23 + $0x90] sm:$0xff] %v5187_v30  ;;  %v5141_v20 = vadd.f32 %v8845_v57, %v5086_v59  ;;  %v6987_v45 = vadd.f32 %v4882_v33, %v8835_v47 }
 0x269   : > { %v5190_v60 = vmax.f32 %v5142_v31, 0.0  ;;  %v5089_v62 = vmul.f32 %v6986_v58, %v8840_v50 }
 0x26a   : > { %v5189_v63 = vmax.f32 %v5141_v20, 0.0  ;;  %v5088_v0 = vmul.f32 %v6987_v45, %v8840_v50  ;;  %v6588_v1 = vpop.f32.mrb[24].mxu1  ;;  %v6892_v2 = vpop.f32.mrb[24].mxu0 }
 0x26b   : > { %5238 = vst [vmem:[%s8853_s23 + $0xa8] sm:$0xff] %v5190_v60  ;;  %v5144_v51 = vadd.f32 %v8845_v57, %v5089_v62  ;;  %v6988_v48 = vadd.f32 %v6892_v2, %v6588_v1  ;;  %v2700_v4 = vpop.f32.mrb[25].mxu1  ;;  %v4892_v5 = vpop.f32.mrb[25].mxu0 }
 0x26c   : > { %5237 = vst [vmem:[%s8853_s23 + $0xa0] sm:$0xff] %v5189_v63  ;;  %v5143_v37 = vadd.f32 %v8845_v57, %v5088_v0  ;;  %v6989_v47 = vadd.f32 %v4892_v5, %v2700_v4 }
 0x26d   : > { %v5192_v6 = vmax.f32 %v5144_v51, 0.0  ;;  %v5091_v9 = vmul.f32 %v6988_v48, %v8840_v50 }
 0x26e   : > { %v5191_v10 = vmax.f32 %v5143_v37, 0.0  ;;  %v5090_v11 = vmul.f32 %v6989_v47, %v8840_v50  ;;  %v6591_v13 = vpop.f32.mrb[26].mxu1  ;;  %v6895_v14 = vpop.f32.mrb[26].mxu0 }
 0x26f   : > { %5240 = vst [vmem:[%s8853_s23 + $0xb8] sm:$0xff] %v5192_v6  ;;  %v5146_v21 = vadd.f32 %v8845_v57, %v5091_v9  ;;  %v6990_v17 = vadd.f32 %v6895_v14, %v6591_v13  ;;  %v2710_v18 = vpop.f32.mrb[27].mxu1  ;;  %v4902_v55 = vpop.f32.mrb[27].mxu0 }
 0x270   : > { %5239 = vst [vmem:[%s8853_s23 + $0xb0] sm:$0xff] %v5191_v10  ;;  %v5145_v19 = vadd.f32 %v8845_v57, %v5090_v11  ;;  %v6991_v22 = vadd.f32 %v4902_v55, %v2710_v18 }
 0x271   : > { %v5194_v46 = vmax.f32 %v5146_v21, 0.0  ;;  %v5093_v8 = vmul.f32 %v6990_v17, %v8840_v50 }
 0x272   : > { %v5193_v3 = vmax.f32 %v5145_v19, 0.0  ;;  %v5092_v34 = vmul.f32 %v6991_v22, %v8840_v50  ;;  %v6594_v36 = vpop.f32.mrb[28].mxu1  ;;  %v6898_v52 = vpop.f32.mrb[28].mxu0 }
 0x273   : > { %5242 = vst [vmem:[%s8853_s23 + $0xc8] sm:$0xff] %v5194_v46  ;;  %v5148_v54 = vadd.f32 %v8845_v57, %v5093_v8  ;;  %v6992_v12 = vadd.f32 %v6898_v52, %v6594_v36  ;;  %v2720_v56 = vpop.f32.mrb[29].mxu1  ;;  %v4912_v24 = vpop.f32.mrb[29].mxu0 }
 0x274   : > { %5241 = vst [vmem:[%s8853_s23 + $0xc0] sm:$0xff] %v5193_v3  ;;  %v5147_v25 = vadd.f32 %v8845_v57, %v5092_v34  ;;  %v6993_v26 = vadd.f32 %v4912_v24, %v2720_v56 }
 0x275   : > { %v5196_v27 = vmax.f32 %v5148_v54, 0.0  ;;  %v5095_v7 = vmul.f32 %v6992_v12, %v8840_v50 }
 0x276   : > { %v5195_v35 = vmax.f32 %v5147_v25, 0.0  ;;  %v5094_v28 = vmul.f32 %v6993_v26, %v8840_v50  ;;  %v6597_v32 = vpop.f32.mrb[30].mxu1  ;;  %v6901_v43 = vpop.f32.mrb[30].mxu0 }
 0x277   : > { %5244 = vst [vmem:[%s8853_s23 + $0xd8] sm:$0xff] %v5196_v27  ;;  %v5150_v29 = vadd.f32 %v8845_v57, %v5095_v7  ;;  %v6994_v49 = vadd.f32 %v6901_v43, %v6597_v32  ;;  %v2730_v39 = vpop.f32.mrb[31].mxu1  ;;  %v4922_v53 = vpop.f32.mrb[31].mxu0 }
 0x278   : > { %5243 = vst [vmem:[%s8853_s23 + $0xd0] sm:$0xff] %v5195_v35  ;;  %v5149_v23 = vadd.f32 %v8845_v57, %v5094_v28  ;;  %v6995_v42 = vadd.f32 %v4922_v53, %v2730_v39 }
 0x279   : > { %v5198_v61 = vmax.f32 %v5150_v29, 0.0  ;;  %v5097_v44 = vmul.f32 %v6994_v49, %v8840_v50 }
 0x27a   : > { %v5197_v15 = vmax.f32 %v5149_v23, 0.0  ;;  %v5096_v16 = vmul.f32 %v6995_v42, %v8840_v50  ;;  %v6600_v38 = vpop.f32.mrb[32].mxu1  ;;  %v6904_v40 = vpop.f32.mrb[32].mxu0 }
 0x27b   : > { %5246 = vst [vmem:[%s8853_s23 + $0xe8] sm:$0xff] %v5198_v61  ;;  %v5152_v30 = vadd.f32 %v8845_v57, %v5097_v44  ;;  %v6996_v59 = vadd.f32 %v6904_v40, %v6600_v38  ;;  %v2740_v41 = vpop.f32.mrb[33].mxu1  ;;  %v4932_v31 = vpop.f32.mrb[33].mxu0 }
 0x27c   : > { %5245 = vst [vmem:[%s8853_s23 + $0xe0] sm:$0xff] %v5197_v15  ;;  %v5151_v58 = vadd.f32 %v8845_v57, %v5096_v16  ;;  %v6997_v33 = vadd.f32 %v4932_v31, %v2740_v41 }
 0x27d   : > { %v5200_v20 = vmax.f32 %v5152_v30, 0.0  ;;  %v5099_v45 = vmul.f32 %v6996_v59, %v8840_v50 }
 0x27e   : > { %v5199_v60 = vmax.f32 %v5151_v58, 0.0  ;;  %v5098_v62 = vmul.f32 %v6997_v33, %v8840_v50  ;;  %v6603_v63 = vpop.f32.mrb[34].mxu1  ;;  %v6907_v0 = vpop.f32.mrb[34].mxu0 }
 0x27f   : > { %5248 = vst [vmem:[%s8853_s23 + $0xf8] sm:$0xff] %v5200_v20  ;;  %v5154_v1 = vadd.f32 %v8845_v57, %v5099_v45  ;;  %v6998_v2 = vadd.f32 %v6907_v0, %v6603_v63  ;;  %v2750_v51 = vpop.f32.mrb[35].mxu1  ;;  %v4942_v48 = vpop.f32.mrb[35].mxu0 }
 0x280   : > { %5247 = vst [vmem:[%s8853_s23 + $0xf0] sm:$0xff] %v5199_v60  ;;  %v5153_v4 = vadd.f32 %v8845_v57, %v5098_v62  ;;  %v6999_v5 = vadd.f32 %v4942_v48, %v2750_v51 }
 0x281   : > { %v5202_v37 = vmax.f32 %v5154_v1, 0.0  ;;  %v5101_v47 = vmul.f32 %v6998_v2, %v8840_v50 }
 0x282   : > { %v5201_v6 = vmax.f32 %v5153_v4, 0.0  ;;  %v5100_v9 = vmul.f32 %v6999_v5, %v8840_v50  ;;  %v6606_v10 = vpop.f32.mrb[36].mxu1  ;;  %v6910_v11 = vpop.f32.mrb[36].mxu0 }
 0x283   : > { %5250 = vst [vmem:[%s8853_s23 + $0x108] sm:$0xff] %v5202_v37  ;;  %v5156_v13 = vadd.f32 %v8845_v57, %v5101_v47  ;;  %v7000_v14 = vadd.f32 %v6910_v11, %v6606_v10  ;;  %v2760_v21 = vpop.f32.mrb[37].mxu1  ;;  %v4952_v17 = vpop.f32.mrb[37].mxu0 }
 0x284   : > { %5249 = vst [vmem:[%s8853_s23 + $0x100] sm:$0xff] %v5201_v6  ;;  %v5155_v18 = vadd.f32 %v8845_v57, %v5100_v9  ;;  %v7001_v55 = vadd.f32 %v4952_v17, %v2760_v21 }
 0x285   : > { %v5204_v19 = vmax.f32 %v5156_v13, 0.0  ;;  %v5103_v22 = vmul.f32 %v7000_v14, %v8840_v50 }
 0x286   : > { %v5203_v46 = vmax.f32 %v5155_v18, 0.0  ;;  %v5102_v8 = vmul.f32 %v7001_v55, %v8840_v50  ;;  %v6609_v3 = vpop.f32.mrb[38].mxu1  ;;  %v6913_v34 = vpop.f32.mrb[38].mxu0 }
 0x287   : > { %5252 = vst [vmem:[%s8853_s23 + $0x118] sm:$0xff] %v5204_v19  ;;  %v5158_v36 = vadd.f32 %v8845_v57, %v5103_v22  ;;  %v7002_v52 = vadd.f32 %v6913_v34, %v6609_v3  ;;  %v2770_v54 = vpop.f32.mrb[39].mxu1  ;;  %v4962_v12 = vpop.f32.mrb[39].mxu0 }
 0x288   : > { %5251 = vst [vmem:[%s8853_s23 + $0x110] sm:$0xff] %v5203_v46  ;;  %v5157_v56 = vadd.f32 %v8845_v57, %v5102_v8  ;;  %v7003_v24 = vadd.f32 %v4962_v12, %v2770_v54 }
 0x289   : > { %v5206_v25 = vmax.f32 %v5158_v36, 0.0  ;;  %v5105_v26 = vmul.f32 %v7002_v52, %v8840_v50 }
 0x28a   : > { %v5205_v27 = vmax.f32 %v5157_v56, 0.0  ;;  %v5104_v7 = vmul.f32 %v7003_v24, %v8840_v50  ;;  %v6612_v35 = vpop.f32.mrb[40].mxu1  ;;  %v6916_v28 = vpop.f32.mrb[40].mxu0 }
 0x28b   : > { %5254 = vst [vmem:[%s8853_s23 + $0x128] sm:$0xff] %v5206_v25  ;;  %v5160_v32 = vadd.f32 %v8845_v57, %v5105_v26  ;;  %v7004_v43 = vadd.f32 %v6916_v28, %v6612_v35  ;;  %v2780_v29 = vpop.f32.mrb[41].mxu1  ;;  %v4972_v49 = vpop.f32.mrb[41].mxu0 }
 0x28c   : > { %5253 = vst [vmem:[%s8853_s23 + $0x120] sm:$0xff] %v5205_v27  ;;  %v5159_v39 = vadd.f32 %v8845_v57, %v5104_v7  ;;  %v7005_v53 = vadd.f32 %v4972_v49, %v2780_v29 }
 0x28d   : > { %v5208_v23 = vmax.f32 %v5160_v32, 0.0  ;;  %v5107_v42 = vmul.f32 %v7004_v43, %v8840_v50 }
 0x28e   : > { %v5207_v61 = vmax.f32 %v5159_v39, 0.0  ;;  %v5106_v44 = vmul.f32 %v7005_v53, %v8840_v50  ;;  %v6615_v15 = vpop.f32.mrb[42].mxu1  ;;  %v6919_v16 = vpop.f32.mrb[42].mxu0 }
 0x28f   : > { %5256 = vst [vmem:[%s8853_s23 + $0x138] sm:$0xff] %v5208_v23  ;;  %v5162_v38 = vadd.f32 %v8845_v57, %v5107_v42  ;;  %v7006_v40 = vadd.f32 %v6919_v16, %v6615_v15  ;;  %v2790_v30 = vpop.f32.mrb[43].mxu1  ;;  %v4982_v59 = vpop.f32.mrb[43].mxu0 }
 0x290   : > { %5255 = vst [vmem:[%s8853_s23 + $0x130] sm:$0xff] %v5207_v61  ;;  %v5161_v41 = vadd.f32 %v8845_v57, %v5106_v44  ;;  %v7007_v31 = vadd.f32 %v4982_v59, %v2790_v30 }
 0x291   : > { %v5210_v58 = vmax.f32 %v5162_v38, 0.0  ;;  %v5109_v33 = vmul.f32 %v7006_v40, %v8840_v50 }
 0x292   : > { %v5209_v20 = vmax.f32 %v5161_v41, 0.0  ;;  %v5108_v45 = vmul.f32 %v7007_v31, %v8840_v50  ;;  %v6618_v60 = vpop.f32.mrb[44].mxu1  ;;  %v6922_v62 = vpop.f32.mrb[44].mxu0 }
 0x293   : > { %5258 = vst [vmem:[%s8853_s23 + $0x148] sm:$0xff] %v5210_v58  ;;  %v5164_v63 = vadd.f32 %v8845_v57, %v5109_v33  ;;  %v7008_v0 = vadd.f32 %v6922_v62, %v6618_v60  ;;  %v2800_v1 = vpop.f32.mrb[45].mxu1  ;;  %v4992_v2 = vpop.f32.mrb[45].mxu0 }
 0x294   : > { %5257 = vst [vmem:[%s8853_s23 + $0x140] sm:$0xff] %v5209_v20  ;;  %v5163_v51 = vadd.f32 %v8845_v57, %v5108_v45  ;;  %v7009_v48 = vadd.f32 %v4992_v2, %v2800_v1 }
 0x295   : > { %v5212_v4 = vmax.f32 %v5164_v63, 0.0  ;;  %v5111_v5 = vmul.f32 %v7008_v0, %v8840_v50 }
 0x296   : > { %v5211_v37 = vmax.f32 %v5163_v51, 0.0  ;;  %v5110_v47 = vmul.f32 %v7009_v48, %v8840_v50  ;;  %v6621_v6 = vpop.f32.mrb[46].mxu1  ;;  %v6925_v9 = vpop.f32.mrb[46].mxu0 }
 0x297   : > { %5260 = vst [vmem:[%s8853_s23 + $0x158] sm:$0xff] %v5212_v4  ;;  %v5166_v10 = vadd.f32 %v8845_v57, %v5111_v5  ;;  %v7010_v11 = vadd.f32 %v6925_v9, %v6621_v6  ;;  %v2810_v13 = vpop.f32.mrb[47].mxu1  ;;  %v5002_v14 = vpop.f32.mrb[47].mxu0 }
 0x298   : > { %5259 = vst [vmem:[%s8853_s23 + $0x150] sm:$0xff] %v5211_v37  ;;  %v5165_v21 = vadd.f32 %v8845_v57, %v5110_v47  ;;  %v7011_v17 = vadd.f32 %v5002_v14, %v2810_v13 }
 0x299   : > { %v5214_v18 = vmax.f32 %v5166_v10, 0.0  ;;  %v5113_v55 = vmul.f32 %v7010_v11, %v8840_v50 }
 0x29a   : > { %v5213_v19 = vmax.f32 %v5165_v21, 0.0  ;;  %v5112_v22 = vmul.f32 %v7011_v17, %v8840_v50 }
 0x29b   : > { %5262 = vst [vmem:[%s8853_s23 + $0x168] sm:$0xff] %v5214_v18  ;;  %v5168_v46 = vadd.f32 %v8845_v57, %v5113_v55 }
 0x29c   : > { %5261 = vst [vmem:[%s8853_s23 + $0x160] sm:$0xff] %v5213_v19  ;;  %v5167_v8 = vadd.f32 %v8845_v57, %v5112_v22 }
 0x29d   : > { %v5216_v3 = vmax.f32 %v5168_v46, 0.0 }
 0x29e   : > { %v5215_v34 = vmax.f32 %v5167_v8, 0.0 }
 0x29f   : > { %5264 = vst [vmem:[%s8853_s23 + $0x178] sm:$0xff] %v5216_v3 }
 0x2a0   : > { %5263 = vst [vmem:[%s8853_s23 + $0x170] sm:$0xff] %v5215_v34 }
 0x2a1 PF: > { %s14_s17 = sadd.s32 1, %s7395_s17   ;;  %s9248_s15 = smov %s7391_s16 }
 0x2a2   : > { %p11_p6 = scmp.ge.s32.totalorder %s14_s17, 4   ;;  %s9249_s16 = smov %s9251_s18 }
 0x2a4   :  { %13 = sbr.rel (!%p11_p6) target bundleno = 2 (0x2), region = 74 }

</bundles_post_ra>
